<compile_context>
chip_gen: v6e
topology: v6e:2x2x1
jax: 0.10.0
libtpu: 0.0.40
codegen_flags: <defaults>
</compile_context>

<pallas_src>
import functools

import jax
import jax.numpy as jnp
from jax.experimental import pallas as pl
from jax.experimental.pallas import tpu as pltpu


HEAD_PAD = 128          # lane-dense width for the tiny classifier head
# M tile for the conv GEMMs.  512 rows keeps the double-buffered footprint
# (2x patch tile + 2x weights + 2x out tile) far below v7x's 64 MiB VMEM while
# still amortizing the ~0.35us/step grid overhead on v5e/v6e.
TILE_M = 512


def _round_up(x, m):
    return (x + m - 1) // m * m


# ----------------------------- Pallas kernels ------------------------------ #

def matmul_bias_act_kernel(x_ref, w_ref, b_ref, o_ref, *, slope):
    # bf16 x bf16 -> f32 accumulate on the MXU; epilogue stays in f32 (v5e has
    # no native bf16 VPU path), cast only at the store.
    acc = jnp.dot(x_ref[...], w_ref[...], preferred_element_type=jnp.float32)
    acc = acc + b_ref[...]                       # (1, N) broadcast over rows
    if slope is not None and slope != 1.0:       # skip identity LeakyReLU(1.0)
        acc = jnp.where(acc >= 0.0, acc, slope * acc)
    o_ref[...] = acc.astype(o_ref.dtype)


def head_loss_kernel(h_ref, w1_ref, b1_ref, w2_ref, b2_ref, y_ref,
                     logits_ref, loss_ref, *, num_classes):
    # Fused classifier head: l1 + ReLU + l2 + log_softmax + mean NLL.
    # Weights are zero-padded to HEAD_PAD lanes; padded class columns are
    # masked out of the softmax with an iota mask.
    h = h_ref[...]                                                   # (B, zdim)
    a1 = jnp.dot(h, w1_ref[...], preferred_element_type=jnp.float32) + b1_ref[...]
    a1 = jnp.maximum(a1, 0.0)                                        # ReLU
    logits = jnp.dot(a1, w2_ref[...], preferred_element_type=jnp.float32) + b2_ref[...]

    col = jax.lax.broadcasted_iota(jnp.int32, logits.shape, 1)
    masked = jnp.where(col < num_classes, logits, jnp.float32(-1e30))
    m = jnp.max(masked, axis=1, keepdims=True)
    lse = m + jnp.log(jnp.sum(jnp.exp(masked - m), axis=1, keepdims=True))
    logsm = logits - lse                                             # log_softmax
    per_row = -jnp.sum(y_ref[...] * logsm, axis=1, keepdims=True)    # (B, 1)
    loss_ref[...] = jnp.sum(per_row, axis=0, keepdims=True) / h.shape[0]
    logits_ref[...] = logits


# --------------------------- pallas_call wrappers --------------------------- #

def pallas_matmul_bias(x, w, b, *, slope, out_dtype, tile_m=TILE_M):
    # x: (M, K) bf16, w: (K, N) bf16, b: (N,) f32.
    M, K = x.shape
    N = w.shape[1]
    if M > tile_m:
        M_pad = _round_up(M, tile_m)
        if M_pad != M:
            x = jnp.pad(x, ((0, M_pad - M), (0, 0)))
        tm = tile_m
    else:
        M_pad, tm = M, M

    kern = functools.partial(matmul_bias_act_kernel, slope=slope)
    cost = pl.CostEstimate(
        flops=2 * M_pad * N * K,
        transcendentals=0,
        bytes_accessed=(x.size * x.dtype.itemsize
                        + w.size * w.dtype.itemsize
                        + b.size * b.dtype.itemsize
                        + M_pad * N * jnp.dtype(out_dtype).itemsize),
    )
    out = pl.pallas_call(
        kern,
        out_shape=jax.ShapeDtypeStruct((M_pad, N), out_dtype),
        grid=(M_pad // tm,),
        in_specs=[
            pl.BlockSpec((tm, K), lambda i: (i, 0)),
            pl.BlockSpec((K, N), lambda i: (0, 0)),
            pl.BlockSpec((1, N), lambda i: (0, 0)),
        ],
        out_specs=pl.BlockSpec((tm, N), lambda i: (i, 0)),
        compiler_params=pltpu.CompilerParams(
            dimension_semantics=("parallel",)),   # shards across v7x's 2 TCs
        cost_estimate=cost,
    )(x, w, b.reshape(1, N))
    return out[:M] if M_pad != M else out


def pallas_head_loss(h, w1, b1, w2, b2, y_pad, num_classes):
    B, zdim = h.shape
    Np = w1.shape[1]
    kern = functools.partial(head_loss_kernel, num_classes=num_classes)
    logits, loss = pl.pallas_call(
        kern,
        out_shape=(jax.ShapeDtypeStruct((B, Np), jnp.float32),
                   jax.ShapeDtypeStruct((1, 1), jnp.float32)),
        grid=(1,),
        in_specs=[
            pl.BlockSpec((B, zdim), lambda i: (0, 0)),
            pl.BlockSpec((zdim, Np), lambda i: (0, 0)),
            pl.BlockSpec((1, Np), lambda i: (0, 0)),
            pl.BlockSpec((Np, Np), lambda i: (0, 0)),
            pl.BlockSpec((1, Np), lambda i: (0, 0)),
            pl.BlockSpec((B, Np), lambda i: (0, 0)),
        ],
        out_specs=(pl.BlockSpec((B, Np), lambda i: (0, 0)),
                   pl.BlockSpec((1, 1), lambda i: (0, 0))),
    )(h, w1, b1.reshape(1, Np), w2, b2.reshape(1, Np), y_pad)
    return logits, loss[0, 0]


# ------------------------------- conv as GEMM ------------------------------- #

def im2col_nhwc(x, kh, kw, stride, pad, pad_value=0.0):
    # x: (B, H, W, C) -> patches (B*OH*OW, KH*KW*C), K ordered (kh, kw, c).
    B, H, W, C = x.shape
    if pad:
        x = jnp.pad(x, ((0, 0), (pad, pad), (pad, pad), (0, 0)),
                    constant_values=pad_value)
    OH = (H + 2 * pad - kh) // stride + 1
    OW = (W + 2 * pad - kw) // stride + 1
    taps = []
    for i in range(kh):
        for j in range(kw):
            taps.append(x[:, i:i + stride * OH:stride, j:j + stride * OW:stride, :])
    p = jnp.stack(taps, axis=3)                       # (B, OH, OW, KH*KW, C)
    return p.reshape(B * OH * OW, kh * kw * C), OH, OW


def conv2d_nhwc(x, wm, b, kh, kw, stride, pad, *, slope, out_dtype,
                pad_value=0.0):
    # x: (B, H, W, C); wm: (KH*KW*C, OC) bf16; b: (OC,) f32.  Returns NHWC.
    B, H, W, C = x.shape
    if kh == 1 and kw == 1 and stride == 1 and pad == 0:
        patches, OH, OW = x.reshape(B * H * W, C), H, W     # 1x1 conv == GEMM
    else:
        patches, OH, OW = im2col_nhwc(x, kh, kw, stride, pad, pad_value)
    out = pallas_matmul_bias(patches, wm, b, slope=slope, out_dtype=out_dtype)
    return out.reshape(B, OH, OW, -1)


# --------------------------- parameter preparation --------------------------- #

def _conv_weight_matrix(w):
    # PyTorch (OC, C, KH, KW) -> (KH*KW*C, OC), row order matching im2col_nhwc.
    OC, C, KH, KW = w.shape
    return jnp.transpose(w, (2, 3, 1, 0)).reshape(KH * KW * C, OC)


def prepare_params(params):
    """One-time wrapper-side prep: fold scale-shift into conv1, cast conv
    weights to bf16 (MXU), pad head weights to HEAD_PAD lanes."""
    p = {}

    # Fold (x+1)/2 into conv1:  conv((x+1)/2, W, b) == conv(x, W/2, b + 0.5*sum W)
    # provided the spatial padding value for the *raw* input is -1 (so padded
    # taps contribute -W/2 + 0.5*W = 0, matching zero-padding of the scaled x).
    w1, b1 = params["c1_w"], params["c1_b"]
    p["c1_wm"] = _conv_weight_matrix(0.5 * w1).astype(jnp.bfloat16)
    p["c1_b"] = (b1 + 0.5 * jnp.sum(w1, axis=(1, 2, 3))).astype(jnp.float32)

    for name in ("c2", "c3", "c4", "c5"):
        p[f"{name}_wm"] = _conv_weight_matrix(params[f"{name}_w"]).astype(jnp.bfloat16)
        p[f"{name}_b"] = params[f"{name}_b"].astype(jnp.float32)

    zdim, cw = params["l1_w"].shape
    ncls = params["l2_w"].shape[1]
    p["l1_w"] = jnp.zeros((zdim, HEAD_PAD), jnp.float32).at[:, :cw].set(params["l1_w"])
    p["l1_b"] = jnp.zeros((HEAD_PAD,), jnp.float32).at[:cw].set(params["l1_b"])
    p["l2_w"] = jnp.zeros((HEAD_PAD, HEAD_PAD), jnp.float32).at[:cw, :ncls].set(params["l2_w"])
    p["l2_b"] = jnp.zeros((HEAD_PAD,), jnp.float32).at[:ncls].set(params["l2_b"])
    return p


# ------------------------------ model forward ------------------------------- #

def convnet_forward(gp, inputs_nchw, labels_onehot, num_classes):
    """Equivalent of ConvNet.forward(inputs, labels, ..., mode='eval').
    Returns (pre_softmax, {"main_cost": nll})."""
    # Single layout change: NCHW -> NHWC, bf16 for the MXU.
    x = jnp.transpose(inputs_nchw, (0, 2, 3, 1)).astype(jnp.bfloat16)

    # nn.LeakyReLU(True) => negative_slope = 1.0 (identity); the GEMM kernel
    # skips it at compile time while preserving exact semantics.
    slope = 1.0
    # (x+1)/2 is folded into c1; pad_value=-1.0 reproduces zero-padding of the
    # scaled input (see prepare_params).
    x = conv2d_nhwc(x, gp["c1_wm"], gp["c1_b"], 4, 4, 2, 1,
                    slope=slope, out_dtype=jnp.bfloat16, pad_value=-1.0)
    x = conv2d_nhwc(x, gp["c2_wm"], gp["c2_b"], 4, 4, 2, 1,
                    slope=slope, out_dtype=jnp.bfloat16)
    x = conv2d_nhwc(x, gp["c3_wm"], gp["c3_b"], 4, 4, 2, 1,
                    slope=slope, out_dtype=jnp.bfloat16)
    x = conv2d_nhwc(x, gp["c4_wm"], gp["c4_b"], 4, 4, 1, 0,
                    slope=slope, out_dtype=jnp.bfloat16)
    x = conv2d_nhwc(x, gp["c5_wm"], gp["c5_b"], 1, 1, 1, 0,
                    slope=None, out_dtype=jnp.float32)

    h = x.reshape(x.shape[0], -1)                    # squeeze (B,1,1,zdim)->(B,zdim)

    # Fused MLP head + log_softmax + NLL in one pallas_call.
    B = h.shape[0]
    y_pad = jnp.zeros((B, HEAD_PAD), jnp.float32).at[:, :num_classes].set(labels_onehot)
    logits_pad, main_cost = pallas_head_loss(
        h, gp["l1_w"], gp["l1_b"], gp["l2_w"], gp["l2_b"], y_pad, num_classes)
    pre_softmax = logits_pad[:, :num_classes]
    return pre_softmax, {"main_cost": main_cost}


# ------------------------------ param init ---------------------------------- #

def xavier_conv(key, shape):
    oc, c, kh, kw = shape
    fan_in, fan_out = c * kh * kw, oc * kh * kw
    limit = (6.0 / (fan_in + fan_out)) ** 0.5
    return jax.random.uniform(key, shape, jnp.float32, -limit, limit)


def xavier_linear(key, shape):
    fan_in, fan_out = shape
    limit = (6.0 / (fan_in + fan_out)) ** 0.5
    return jax.random.uniform(key, shape, jnp.float32, -limit, limit)


if __name__ == "__main__":
    # Small, module-consistent config: the conv stack needs 32x32 input to
    # reach 1x1 spatial before the squeeze.
    B, zdim, cwidths, num_classes = 2, 16, 32, 4

    key = jax.random.PRNGKey(0)
    ks = jax.random.split(key, 16)

    params = {
        "c1_w": xavier_conv(ks[0], (32, 3, 4, 4)),
        "c1_b": 0.01 * jax.random.normal(ks[1], (32,), jnp.float32),
        "c2_w": xavier_conv(ks[2], (64, 32, 4, 4)),
        "c2_b": 0.01 * jax.random.normal(ks[3], (64,), jnp.float32),
        "c3_w": xavier_conv(ks[4], (64, 64, 4, 4)),
        "c3_b": 0.01 * jax.random.normal(ks[5], (64,), jnp.float32),
        "c4_w": xavier_conv(ks[6], (256, 64, 4, 4)),
        "c4_b": 0.01 * jax.random.normal(ks[7], (256,), jnp.float32),
        "c5_w": xavier_conv(ks[8], (zdim, 256, 1, 1)),
        "c5_b": 0.01 * jax.random.normal(ks[9], (zdim,), jnp.float32),
        "l1_w": xavier_linear(ks[10], (zdim, cwidths)),
        "l1_b": jnp.zeros((cwidths,), jnp.float32),
        "l2_w": xavier_linear(ks[11], (cwidths, num_classes)),
        "l2_b": jnp.zeros((num_classes,), jnp.float32),
    }

    inputs = jax.random.uniform(ks[12], (B, 3, 32, 32), jnp.float32, -1.0, 1.0)
    labels = jnp.array([1, 3], dtype=jnp.int32)
    labels_onehot = jax.nn.one_hot(labels, num_classes, dtype=jnp.float32)

    gemm_params = prepare_params(params)          # one-time wrapper-side prep

    fwd = jax.jit(convnet_forward, static_argnums=(3,))
    pre_softmax, cost_dict = fwd(gemm_params, inputs, labels_onehot, num_classes)
    jax.block_until_ready((pre_softmax, cost_dict["main_cost"]))

    assert pre_softmax.shape == (B, num_classes)
    assert cost_dict["main_cost"].shape == ()
    print("KERNEL_OK")
</pallas_src>

<mosaic_0001>
module attributes {stable_mosaic.version = 11 : i64} {
  func.func @matmul_bias_act_kernel(%arg0: i32, %arg1: memref<512x48xbf16, #tpu.memory_space<vmem>>, %arg2: memref<48x32xbf16, #tpu.memory_space<vmem>>, %arg3: memref<1x32xf32, #tpu.memory_space<vmem>>, %arg4: memref<512x32xbf16, #tpu.memory_space<vmem>>) attributes {dimension_semantics = [#tpu.dimension_semantics<parallel>], iteration_bounds = array<i64: 1>, scalar_prefetch = 0 : i64, scratch_operands = 0 : i64, tpu.core_type = #tpu.core_type<tc>, window_params = [{transform_indices = @transform_0, window_bounds = array<i64: 512, 48>}, {pipeline_mode = #tpu.pipeline_mode<synchronous>, transform_indices = @transform_1, window_bounds = array<i64: 48, 32>}, {pipeline_mode = #tpu.pipeline_mode<synchronous>, transform_indices = @transform_2, window_bounds = array<i64: 1, 32>}, {transform_indices = @transform_3, window_bounds = array<i64: 512, 32>}]} {
    %c0 = arith.constant 0 : index
    %c0_0 = arith.constant 0 : index
    %0 = vector.load %arg1[%c0, %c0_0] : memref<512x48xbf16, #tpu.memory_space<vmem>>, vector<512x48xbf16>
    %c0_1 = arith.constant 0 : index
    %c0_2 = arith.constant 0 : index
    %1 = vector.load %arg2[%c0_1, %c0_2] : memref<48x32xbf16, #tpu.memory_space<vmem>>, vector<48x32xbf16>
    %cst = arith.constant dense<0.000000e+00> : vector<512x32xf32>
    %2 = tpu.matmul %0, %1, %cst {dimension_numbers = #tpu.dot_dimension_numbers<[1], [0], [0], [1], [0, 0, 1, 1], [], []>} : vector<512x48xbf16>, vector<48x32xbf16>, vector<512x32xf32> -> vector<512x32xf32>
    %c0_3 = arith.constant 0 : index
    %c0_4 = arith.constant 0 : index
    %3 = vector.load %arg3[%c0_3, %c0_4] : memref<1x32xf32, #tpu.memory_space<vmem>>, vector<1x32xf32>
    %4 = vector.broadcast %3 : vector<1x32xf32> to vector<512x32xf32>
    %5 = arith.addf %2, %4 : vector<512x32xf32>
    %6 = arith.truncf %5 : vector<512x32xf32> to vector<512x32xbf16>
    %c0_5 = arith.constant 0 : index
    %c0_6 = arith.constant 0 : index
    %7 = vector.load %arg4[%c0_5, %c0_6] : memref<512x32xbf16, #tpu.memory_space<vmem>>, vector<512x32xbf16>
    tpu.vector_store %arg4[%c0_5, %c0_6], %6 {strides = array<i32>} : memref<512x32xbf16, #tpu.memory_space<vmem>>, vector<512x32xbf16>,
    return
  }
  func.func @transform_0(%arg0: i32) -> (i32, i32) {
    %c0_i32 = arith.constant 0 : i32
    %c0_i32_0 = arith.constant 0 : i32
    return %arg0, %c0_i32 : i32, i32
  }
  func.func @transform_1(%arg0: i32) -> (i32, i32) {
    %c0_i32 = arith.constant 0 : i32
    %c0_i32_0 = arith.constant 0 : i32
    %c0_i32_1 = arith.constant 0 : i32
    return %c0_i32, %c0_i32_0 : i32, i32
  }
  func.func @transform_2(%arg0: i32) -> (i32, i32) {
    %c0_i32 = arith.constant 0 : i32
    %c0_i32_0 = arith.constant 0 : i32
    %c0_i32_1 = arith.constant 0 : i32
    return %c0_i32, %c0_i32_0 : i32, i32
  }
  func.func @transform_3(%arg0: i32) -> (i32, i32) {
    %c0_i32 = arith.constant 0 : i32
    %c0_i32_0 = arith.constant 0 : i32
    return %arg0, %c0_i32 : i32, i32
  }
}

module attributes {stable_mosaic.version = 11 : i64} {
  func.func @matmul_bias_act_kernel(%arg0: i32, %arg1: memref<128x512xbf16, #tpu.memory_space<vmem>>, %arg2: memref<512x64xbf16, #tpu.memory_space<vmem>>, %arg3: memref<1x64xf32, #tpu.memory_space<vmem>>, %arg4: memref<128x64xbf16, #tpu.memory_space<vmem>>) attributes {dimension_semantics = [#tpu.dimension_semantics<parallel>], iteration_bounds = array<i64: 1>, scalar_prefetch = 0 : i64, scratch_operands = 0 : i64, tpu.core_type = #tpu.core_type<tc>, window_params = [{transform_indices = @transform_0, window_bounds = array<i64: 128, 512>}, {pipeline_mode = #tpu.pipeline_mode<synchronous>, transform_indices = @transform_1, window_bounds = array<i64: 512, 64>}, {pipeline_mode = #tpu.pipeline_mode<synchronous>, transform_indices = @transform_2, window_bounds = array<i64: 1, 64>}, {transform_indices = @transform_3, window_bounds = array<i64: 128, 64>}]} {
    %c0 = arith.constant 0 : index
    %c0_0 = arith.constant 0 : index
    %0 = vector.load %arg1[%c0, %c0_0] : memref<128x512xbf16, #tpu.memory_space<vmem>>, vector<128x512xbf16>
    %c0_1 = arith.constant 0 : index
    %c0_2 = arith.constant 0 : index
    %1 = vector.load %arg2[%c0_1, %c0_2] : memref<512x64xbf16, #tpu.memory_space<vmem>>, vector<512x64xbf16>
    %cst = arith.constant dense<0.000000e+00> : vector<128x64xf32>
    %2 = tpu.matmul %0, %1, %cst {dimension_numbers = #tpu.dot_dimension_numbers<[1], [0], [0], [1], [0, 0, 1, 1], [], []>} : vector<128x512xbf16>, vector<512x64xbf16>, vector<128x64xf32> -> vector<128x64xf32>
    %c0_3 = arith.constant 0 : index
    %c0_4 = arith.constant 0 : index
    %3 = vector.load %arg3[%c0_3, %c0_4] : memref<1x64xf32, #tpu.memory_space<vmem>>, vector<1x64xf32>
    %4 = vector.broadcast %3 : vector<1x64xf32> to vector<128x64xf32>
    %5 = arith.addf %2, %4 : vector<128x64xf32>
    %6 = arith.truncf %5 : vector<128x64xf32> to vector<128x64xbf16>
    %c0_5 = arith.constant 0 : index
    %c0_6 = arith.constant 0 : index
    %7 = vector.load %arg4[%c0_5, %c0_6] : memref<128x64xbf16, #tpu.memory_space<vmem>>, vector<128x64xbf16>
    tpu.vector_store %arg4[%c0_5, %c0_6], %6 {strides = array<i32>} : memref<128x64xbf16, #tpu.memory_space<vmem>>, vector<128x64xbf16>,
    return
  }
  func.func @transform_0(%arg0: i32) -> (i32, i32) {
    %c0_i32 = arith.constant 0 : i32
    %c0_i32_0 = arith.constant 0 : i32
    return %arg0, %c0_i32 : i32, i32
  }
  func.func @transform_1(%arg0: i32) -> (i32, i32) {
    %c0_i32 = arith.constant 0 : i32
    %c0_i32_0 = arith.constant 0 : i32
    %c0_i32_1 = arith.constant 0 : i32
    return %c0_i32, %c0_i32_0 : i32, i32
  }
  func.func @transform_2(%arg0: i32) -> (i32, i32) {
    %c0_i32 = arith.constant 0 : i32
    %c0_i32_0 = arith.constant 0 : i32
    %c0_i32_1 = arith.constant 0 : i32
    return %c0_i32, %c0_i32_0 : i32, i32
  }
  func.func @transform_3(%arg0: i32) -> (i32, i32) {
    %c0_i32 = arith.constant 0 : i32
    %c0_i32_0 = arith.constant 0 : i32
    return %arg0, %c0_i32 : i32, i32
  }
}

module attributes {stable_mosaic.version = 11 : i64} {
  func.func @matmul_bias_act_kernel(%arg0: i32, %arg1: memref<32x1024xbf16, #tpu.memory_space<vmem>>, %arg2: memref<1024x64xbf16, #tpu.memory_space<vmem>>, %arg3: memref<1x64xf32, #tpu.memory_space<vmem>>, %arg4: memref<32x64xbf16, #tpu.memory_space<vmem>>) attributes {dimension_semantics = [#tpu.dimension_semantics<parallel>], iteration_bounds = array<i64: 1>, scalar_prefetch = 0 : i64, scratch_operands = 0 : i64, tpu.core_type = #tpu.core_type<tc>, window_params = [{transform_indices = @transform_0, window_bounds = array<i64: 32, 1024>}, {pipeline_mode = #tpu.pipeline_mode<synchronous>, transform_indices = @transform_1, window_bounds = array<i64: 1024, 64>}, {pipeline_mode = #tpu.pipeline_mode<synchronous>, transform_indices = @transform_2, window_bounds = array<i64: 1, 64>}, {transform_indices = @transform_3, window_bounds = array<i64: 32, 64>}]} {
    %c0 = arith.constant 0 : index
    %c0_0 = arith.constant 0 : index
    %0 = vector.load %arg1[%c0, %c0_0] : memref<32x1024xbf16, #tpu.memory_space<vmem>>, vector<32x1024xbf16>
    %c0_1 = arith.constant 0 : index
    %c0_2 = arith.constant 0 : index
    %1 = vector.load %arg2[%c0_1, %c0_2] : memref<1024x64xbf16, #tpu.memory_space<vmem>>, vector<1024x64xbf16>
    %cst = arith.constant dense<0.000000e+00> : vector<32x64xf32>
    %2 = tpu.matmul %0, %1, %cst {dimension_numbers = #tpu.dot_dimension_numbers<[1], [0], [0], [1], [0, 0, 1, 1], [], []>} : vector<32x1024xbf16>, vector<1024x64xbf16>, vector<32x64xf32> -> vector<32x64xf32>
    %c0_3 = arith.constant 0 : index
    %c0_4 = arith.constant 0 : index
    %3 = vector.load %arg3[%c0_3, %c0_4] : memref<1x64xf32, #tpu.memory_space<vmem>>, vector<1x64xf32>
    %4 = vector.broadcast %3 : vector<1x64xf32> to vector<32x64xf32>
    %5 = arith.addf %2, %4 : vector<32x64xf32>
    %6 = arith.truncf %5 : vector<32x64xf32> to vector<32x64xbf16>
    %c0_5 = arith.constant 0 : index
    %c0_6 = arith.constant 0 : index
    %7 = vector.load %arg4[%c0_5, %c0_6] : memref<32x64xbf16, #tpu.memory_space<vmem>>, vector<32x64xbf16>
    tpu.vector_store %arg4[%c0_5, %c0_6], %6 {strides = array<i32>} : memref<32x64xbf16, #tpu.memory_space<vmem>>, vector<32x64xbf16>,
    return
  }
  func.func @transform_0(%arg0: i32) -> (i32, i32) {
    %c0_i32 = arith.constant 0 : i32
    %c0_i32_0 = arith.constant 0 : i32
    return %arg0, %c0_i32 : i32, i32
  }
  func.func @transform_1(%arg0: i32) -> (i32, i32) {
    %c0_i32 = arith.constant 0 : i32
    %c0_i32_0 = arith.constant 0 : i32
    %c0_i32_1 = arith.constant 0 : i32
    return %c0_i32, %c0_i32_0 : i32, i32
  }
  func.func @transform_2(%arg0: i32) -> (i32, i32) {
    %c0_i32 = arith.constant 0 : i32
    %c0_i32_0 = arith.constant 0 : i32
    %c0_i32_1 = arith.constant 0 : i32
    return %c0_i32, %c0_i32_0 : i32, i32
  }
  func.func @transform_3(%arg0: i32) -> (i32, i32) {
    %c0_i32 = arith.constant 0 : i32
    %c0_i32_0 = arith.constant 0 : i32
    return %arg0, %c0_i32 : i32, i32
  }
}

module attributes {stable_mosaic.version = 11 : i64} {
  func.func @matmul_bias_act_kernel(%arg0: i32, %arg1: memref<2x1024xbf16, #tpu.memory_space<vmem>>, %arg2: memref<1024x256xbf16, #tpu.memory_space<vmem>>, %arg3: memref<1x256xf32, #tpu.memory_space<vmem>>, %arg4: memref<2x256xbf16, #tpu.memory_space<vmem>>) attributes {dimension_semantics = [#tpu.dimension_semantics<parallel>], iteration_bounds = array<i64: 1>, scalar_prefetch = 0 : i64, scratch_operands = 0 : i64, tpu.core_type = #tpu.core_type<tc>, window_params = [{transform_indices = @transform_0, window_bounds = array<i64: 2, 1024>}, {pipeline_mode = #tpu.pipeline_mode<synchronous>, transform_indices = @transform_1, window_bounds = array<i64: 1024, 256>}, {pipeline_mode = #tpu.pipeline_mode<synchronous>, transform_indices = @transform_2, window_bounds = array<i64: 1, 256>}, {transform_indices = @transform_3, window_bounds = array<i64: 2, 256>}]} {
    %c0 = arith.constant 0 : index
    %c0_0 = arith.constant 0 : index
    %0 = vector.load %arg1[%c0, %c0_0] : memref<2x1024xbf16, #tpu.memory_space<vmem>>, vector<2x1024xbf16>
    %c0_1 = arith.constant 0 : index
    %c0_2 = arith.constant 0 : index
    %1 = vector.load %arg2[%c0_1, %c0_2] : memref<1024x256xbf16, #tpu.memory_space<vmem>>, vector<1024x256xbf16>
    %cst = arith.constant dense<0.000000e+00> : vector<2x256xf32>
    %2 = tpu.matmul %0, %1, %cst {dimension_numbers = #tpu.dot_dimension_numbers<[1], [0], [0], [1], [0, 0, 1, 1], [], []>} : vector<2x1024xbf16>, vector<1024x256xbf16>, vector<2x256xf32> -> vector<2x256xf32>
    %c0_3 = arith.constant 0 : index
    %c0_4 = arith.constant 0 : index
    %3 = vector.load %arg3[%c0_3, %c0_4] : memref<1x256xf32, #tpu.memory_space<vmem>>, vector<1x256xf32>
    %4 = vector.broadcast %3 : vector<1x256xf32> to vector<2x256xf32>
    %5 = arith.addf %2, %4 : vector<2x256xf32>
    %6 = arith.truncf %5 : vector<2x256xf32> to vector<2x256xbf16>
    %c0_5 = arith.constant 0 : index
    %c0_6 = arith.constant 0 : index
    %7 = vector.load %arg4[%c0_5, %c0_6] : memref<2x256xbf16, #tpu.memory_space<vmem>>, vector<2x256xbf16>
    tpu.vector_store %arg4[%c0_5, %c0_6], %6 {strides = array<i32>} : memref<2x256xbf16, #tpu.memory_space<vmem>>, vector<2x256xbf16>,
    return
  }
  func.func @transform_0(%arg0: i32) -> (i32, i32) {
    %c0_i32 = arith.constant 0 : i32
    %c0_i32_0 = arith.constant 0 : i32
    return %arg0, %c0_i32 : i32, i32
  }
  func.func @transform_1(%arg0: i32) -> (i32, i32) {
    %c0_i32 = arith.constant 0 : i32
    %c0_i32_0 = arith.constant 0 : i32
    %c0_i32_1 = arith.constant 0 : i32
    return %c0_i32, %c0_i32_0 : i32, i32
  }
  func.func @transform_2(%arg0: i32) -> (i32, i32) {
    %c0_i32 = arith.constant 0 : i32
    %c0_i32_0 = arith.constant 0 : i32
    %c0_i32_1 = arith.constant 0 : i32
    return %c0_i32, %c0_i32_0 : i32, i32
  }
  func.func @transform_3(%arg0: i32) -> (i32, i32) {
    %c0_i32 = arith.constant 0 : i32
    %c0_i32_0 = arith.constant 0 : i32
    return %arg0, %c0_i32 : i32, i32
  }
}

module attributes {stable_mosaic.version = 11 : i64} {
  func.func @matmul_bias_act_kernel(%arg0: i32, %arg1: memref<2x256xbf16, #tpu.memory_space<vmem>>, %arg2: memref<256x16xbf16, #tpu.memory_space<vmem>>, %arg3: memref<1x16xf32, #tpu.memory_space<vmem>>, %arg4: memref<2x16xf32, #tpu.memory_space<vmem>>) attributes {dimension_semantics = [#tpu.dimension_semantics<parallel>], iteration_bounds = array<i64: 1>, scalar_prefetch = 0 : i64, scratch_operands = 0 : i64, tpu.core_type = #tpu.core_type<tc>, window_params = [{transform_indices = @transform_0, window_bounds = array<i64: 2, 256>}, {pipeline_mode = #tpu.pipeline_mode<synchronous>, transform_indices = @transform_1, window_bounds = array<i64: 256, 16>}, {pipeline_mode = #tpu.pipeline_mode<synchronous>, transform_indices = @transform_2, window_bounds = array<i64: 1, 16>}, {transform_indices = @transform_3, window_bounds = array<i64: 2, 16>}]} {
    %c0 = arith.constant 0 : index
    %c0_0 = arith.constant 0 : index
    %0 = vector.load %arg1[%c0, %c0_0] : memref<2x256xbf16, #tpu.memory_space<vmem>>, vector<2x256xbf16>
    %c0_1 = arith.constant 0 : index
    %c0_2 = arith.constant 0 : index
    %1 = vector.load %arg2[%c0_1, %c0_2] : memref<256x16xbf16, #tpu.memory_space<vmem>>, vector<256x16xbf16>
    %cst = arith.constant dense<0.000000e+00> : vector<2x16xf32>
    %2 = tpu.matmul %0, %1, %cst {dimension_numbers = #tpu.dot_dimension_numbers<[1], [0], [0], [1], [0, 0, 1, 1], [], []>} : vector<2x256xbf16>, vector<256x16xbf16>, vector<2x16xf32> -> vector<2x16xf32>
    %c0_3 = arith.constant 0 : index
    %c0_4 = arith.constant 0 : index
    %3 = vector.load %arg3[%c0_3, %c0_4] : memref<1x16xf32, #tpu.memory_space<vmem>>, vector<1x16xf32>
    %4 = vector.broadcast %3 : vector<1x16xf32> to vector<2x16xf32>
    %5 = arith.addf %2, %4 : vector<2x16xf32>
    %c0_5 = arith.constant 0 : index
    %c0_6 = arith.constant 0 : index
    %6 = vector.load %arg4[%c0_5, %c0_6] : memref<2x16xf32, #tpu.memory_space<vmem>>, vector<2x16xf32>
    tpu.vector_store %arg4[%c0_5, %c0_6], %5 {strides = array<i32>} : memref<2x16xf32, #tpu.memory_space<vmem>>, vector<2x16xf32>,
    return
  }
  func.func @transform_0(%arg0: i32) -> (i32, i32) {
    %c0_i32 = arith.constant 0 : i32
    %c0_i32_0 = arith.constant 0 : i32
    return %arg0, %c0_i32 : i32, i32
  }
  func.func @transform_1(%arg0: i32) -> (i32, i32) {
    %c0_i32 = arith.constant 0 : i32
    %c0_i32_0 = arith.constant 0 : i32
    %c0_i32_1 = arith.constant 0 : i32
    return %c0_i32, %c0_i32_0 : i32, i32
  }
  func.func @transform_2(%arg0: i32) -> (i32, i32) {
    %c0_i32 = arith.constant 0 : i32
    %c0_i32_0 = arith.constant 0 : i32
    %c0_i32_1 = arith.constant 0 : i32
    return %c0_i32, %c0_i32_0 : i32, i32
  }
  func.func @transform_3(%arg0: i32) -> (i32, i32) {
    %c0_i32 = arith.constant 0 : i32
    %c0_i32_0 = arith.constant 0 : i32
    return %arg0, %c0_i32 : i32, i32
  }
}

module attributes {stable_mosaic.version = 11 : i64} {
  func.func @head_loss_kernel(%arg0: i32, %arg1: memref<2x16xf32, #tpu.memory_space<vmem>>, %arg2: memref<16x128xf32, #tpu.memory_space<vmem>>, %arg3: memref<1x128xf32, #tpu.memory_space<vmem>>, %arg4: memref<128x128xf32, #tpu.memory_space<vmem>>, %arg5: memref<1x128xf32, #tpu.memory_space<vmem>>, %arg6: memref<2x128xf32, #tpu.memory_space<vmem>>, %arg7: memref<2x128xf32, #tpu.memory_space<vmem>>, %arg8: memref<1x1xf32, #tpu.memory_space<vmem>>) attributes {dimension_semantics = [#tpu.dimension_semantics<arbitrary>], iteration_bounds = array<i64: 1>, scalar_prefetch = 0 : i64, scratch_operands = 0 : i64, tpu.core_type = #tpu.core_type<tc>, window_params = [{pipeline_mode = #tpu.pipeline_mode<synchronous>, transform_indices = @transform_0, window_bounds = array<i64: 2, 16>}, {pipeline_mode = #tpu.pipeline_mode<synchronous>, transform_indices = @transform_1, window_bounds = array<i64: 16, 128>}, {pipeline_mode = #tpu.pipeline_mode<synchronous>, transform_indices = @transform_2, window_bounds = array<i64: 1, 128>}, {pipeline_mode = #tpu.pipeline_mode<synchronous>, transform_indices = @transform_3, window_bounds = array<i64: 128, 128>}, {pipeline_mode = #tpu.pipeline_mode<synchronous>, transform_indices = @transform_4, window_bounds = array<i64: 1, 128>}, {pipeline_mode = #tpu.pipeline_mode<synchronous>, transform_indices = @transform_5, window_bounds = array<i64: 2, 128>}, {pipeline_mode = #tpu.pipeline_mode<synchronous>, transform_indices = @transform_6, window_bounds = array<i64: 2, 128>}, {pipeline_mode = #tpu.pipeline_mode<synchronous>, transform_indices = @transform_7, window_bounds = array<i64: 1, 1>}]} {
    %c0 = arith.constant 0 : index
    %c0_0 = arith.constant 0 : index
    %0 = vector.load %arg1[%c0, %c0_0] : memref<2x16xf32, #tpu.memory_space<vmem>>, vector<2x16xf32>
    %c0_1 = arith.constant 0 : index
    %c0_2 = arith.constant 0 : index
    %1 = vector.load %arg2[%c0_1, %c0_2] : memref<16x128xf32, #tpu.memory_space<vmem>>, vector<16x128xf32>
    %cst = arith.constant dense<0.000000e+00> : vector<2x128xf32>
    %2 = tpu.matmul %0, %1, %cst {dimension_numbers = #tpu.dot_dimension_numbers<[1], [0], [0], [1], [0, 0, 1, 1], [], []>} : vector<2x16xf32>, vector<16x128xf32>, vector<2x128xf32> -> vector<2x128xf32>
    %c0_3 = arith.constant 0 : index
    %c0_4 = arith.constant 0 : index
    %3 = vector.load %arg3[%c0_3, %c0_4] : memref<1x128xf32, #tpu.memory_space<vmem>>, vector<1x128xf32>
    %4 = vector.broadcast %3 : vector<1x128xf32> to vector<2x128xf32>
    %5 = arith.addf %2, %4 : vector<2x128xf32>
    %cst_5 = arith.constant 0.000000e+00 : f32
    %6 = vector.broadcast %cst_5 : f32 to vector<2x128xf32>
    %7 = arith.maximumf %5, %6 : vector<2x128xf32>
    %c0_6 = arith.constant 0 : index
    %c0_7 = arith.constant 0 : index
    %8 = vector.load %arg4[%c0_6, %c0_7] : memref<128x128xf32, #tpu.memory_space<vmem>>, vector<128x128xf32>
    %cst_8 = arith.constant dense<0.000000e+00> : vector<2x128xf32>
    %9 = tpu.matmul %7, %8, %cst_8 {dimension_numbers = #tpu.dot_dimension_numbers<[1], [0], [0], [1], [0, 0, 1, 1], [], []>} : vector<2x128xf32>, vector<128x128xf32>, vector<2x128xf32> -> vector<2x128xf32>
    %c0_9 = arith.constant 0 : index
    %c0_10 = arith.constant 0 : index
    %10 = vector.load %arg5[%c0_9, %c0_10] : memref<1x128xf32, #tpu.memory_space<vmem>>, vector<1x128xf32>
    %11 = vector.broadcast %10 : vector<1x128xf32> to vector<2x128xf32>
    %12 = arith.addf %9, %11 : vector<2x128xf32>
    %13 = tpu.iota {dimensions = array<i32: 1>} : vector<2x128xi32>
    %c4_i32 = arith.constant 4 : i32
    %14 = vector.broadcast %c4_i32 : i32 to vector<2x128xi32>
    %15 = arith.cmpi slt, %13, %14 : vector<2x128xi32>
    %cst_11 = arith.constant -1.000000e+30 : f32
    %16 = vector.broadcast %cst_11 : f32 to vector<2x128xf32>
    %17 = arith.select %15, %12, %16 : vector<2x128xi1>, vector<2x128xf32>
    %cst_12 = arith.constant dense<0xFF800000> : vector<2xf32>
    %18 = vector.multi_reduction <maximumf>, %17, %cst_12 [1] : vector<2x128xf32> to vector<2xf32>
    %19 = vector.shape_cast %18 : vector<2xf32> to vector<2x1xf32>
    %20 = vector.broadcast %19 : vector<2x1xf32> to vector<2x128xf32>
    %21 = arith.subf %17, %20 : vector<2x128xf32>
    %22 = math.exp %21 : vector<2x128xf32>
    %cst_13 = arith.constant dense<0.000000e+00> : vector<2xf32>
    %23 = vector.multi_reduction <add>, %22, %cst_13 [1] : vector<2x128xf32> to vector<2xf32>
    %24 = vector.shape_cast %23 : vector<2xf32> to vector<2x1xf32>
    %25 = math.log %24 : vector<2x1xf32>
    %26 = arith.addf %19, %25 : vector<2x1xf32>
    %27 = vector.broadcast %26 : vector<2x1xf32> to vector<2x128xf32>
    %28 = arith.subf %12, %27 : vector<2x128xf32>
    %c0_14 = arith.constant 0 : index
    %c0_15 = arith.constant 0 : index
    %29 = vector.load %arg6[%c0_14, %c0_15] : memref<2x128xf32, #tpu.memory_space<vmem>>, vector<2x128xf32>
    %30 = arith.mulf %29, %28 : vector<2x128xf32>
    %cst_16 = arith.constant dense<0.000000e+00> : vector<2xf32>
    %31 = vector.multi_reduction <add>, %30, %cst_16 [1] : vector<2x128xf32> to vector<2xf32>
    %32 = vector.shape_cast %31 : vector<2xf32> to vector<2x1xf32>
    %cst_17 = arith.constant 0.000000e+00 : f32
    %33 = vector.broadcast %cst_17 : f32 to vector<2x1xf32>
    %34 = arith.subf %33, %32 : vector<2x1xf32>
    %cst_18 = arith.constant dense<0.000000e+00> : vector<1xf32>
    %35 = vector.multi_reduction <add>, %34, %cst_18 [0] : vector<2x1xf32> to vector<1xf32>
    %36 = vector.shape_cast %35 : vector<1xf32> to vector<1x1xf32>
    %cst_19 = arith.constant 2.000000e+00 : f32
    %37 = vector.broadcast %cst_19 : f32 to vector<1x1xf32>
    %38 = arith.divf %36, %37 : vector<1x1xf32>
    %c0_20 = arith.constant 0 : index
    %c0_21 = arith.constant 0 : index
    %39 = vector.load %arg8[%c0_20, %c0_21] : memref<1x1xf32, #tpu.memory_space<vmem>>, vector<1x1xf32>
    tpu.vector_store %arg8[%c0_20, %c0_21], %38 {strides = array<i32>} : memref<1x1xf32, #tpu.memory_space<vmem>>, vector<1x1xf32>,
    %c0_22 = arith.constant 0 : index
    %c0_23 = arith.constant 0 : index
    %40 = vector.load %arg7[%c0_22, %c0_23] : memref<2x128xf32, #tpu.memory_space<vmem>>, vector<2x128xf32>
    tpu.vector_store %arg7[%c0_22, %c0_23], %12 {strides = array<i32>} : memref<2x128xf32, #tpu.memory_space<vmem>>, vector<2x128xf32>,
    return
  }
  func.func @transform_0(%arg0: i32) -> (i32, i32) {
    %c0_i32 = arith.constant 0 : i32
    %c0_i32_0 = arith.constant 0 : i32
    %c0_i32_1 = arith.constant 0 : i32
    return %c0_i32, %c0_i32_0 : i32, i32
  }
  func.func @transform_1(%arg0: i32) -> (i32, i32) {
    %c0_i32 = arith.constant 0 : i32
    %c0_i32_0 = arith.constant 0 : i32
    %c0_i32_1 = arith.constant 0 : i32
    return %c0_i32, %c0_i32_0 : i32, i32
  }
  func.func @transform_2(%arg0: i32) -> (i32, i32) {
    %c0_i32 = arith.constant 0 : i32
    %c0_i32_0 = arith.constant 0 : i32
    %c0_i32_1 = arith.constant 0 : i32
    return %c0_i32, %c0_i32_0 : i32, i32
  }
  func.func @transform_3(%arg0: i32) -> (i32, i32) {
    %c0_i32 = arith.constant 0 : i32
    %c0_i32_0 = arith.constant 0 : i32
    %c0_i32_1 = arith.constant 0 : i32
    return %c0_i32, %c0_i32_0 : i32, i32
  }
  func.func @transform_4(%arg0: i32) -> (i32, i32) {
    %c0_i32 = arith.constant 0 : i32
    %c0_i32_0 = arith.constant 0 : i32
    %c0_i32_1 = arith.constant 0 : i32
    return %c0_i32, %c0_i32_0 : i32, i32
  }
  func.func @transform_5(%arg0: i32) -> (i32, i32) {
    %c0_i32 = arith.constant 0 : i32
    %c0_i32_0 = arith.constant 0 : i32
    %c0_i32_1 = arith.constant 0 : i32
    return %c0_i32, %c0_i32_0 : i32, i32
  }
  func.func @transform_6(%arg0: i32) -> (i32, i32) {
    %c0_i32 = arith.constant 0 : i32
    %c0_i32_0 = arith.constant 0 : i32
    %c0_i32_1 = arith.constant 0 : i32
    return %c0_i32, %c0_i32_0 : i32, i32
  }
  func.func @transform_7(%arg0: i32) -> (i32, i32) {
    %c0_i32 = arith.constant 0 : i32
    %c0_i32_0 = arith.constant 0 : i32
    %c0_i32_1 = arith.constant 0 : i32
    return %c0_i32, %c0_i32_0 : i32, i32
  }
}

</mosaic_0001>

<bundles_post_ra>
// kernel: convnet_forward.6
= control target key start
LH: loop header
LB: loop body
LE: loop exit
PB: predicated region body
PF: predicated region fallthrough
CT: control target
= control target key end

     0   :  { %vm270_vm0 = vcmask 392192   ;;  %vm912_vm1 = vcmask 257024   ;;  %s1805_s1 = inlined_call_operand.vmem [shape: bf16[48,32], index: 1, kind: input, shape index: {}]   ;;  %s1806_s0 = inlined_call_operand.vmem [shape: bf16[512,48], index: 0, kind: input, shape index: {}]   ;;  %s1807_s2 = inlined_call_operand.vmem [shape: f32[1,32], index: 2, kind: input, shape index: {}]   ;;  %s1808_s3 = inlined_call_operand.vmem [shape: bf16[512,32], index: 3, kind: output, shape index: {}]  }
   0x1   :  { %v1288_v0 = vld [vmem:[%s1805_s1 + $0x10] sm:$0xff]   ;;  %v1289_v1 = vld [vmem:[%s1805_s1 + $0x8] sm:$0xff]   ;;  %v1290_v2 = vld [vmem:[%s1805_s1] sm:$0xff]  }
   0x2   :  { %1212 = vmatprep.subr.bf16.mxu0 %v1288_v0  ;;  %1282 = vmatprep.subr.bf16.mxu1 %v1288_v0  ;;  %v1291_v3 = vld [vmem:[%s1806_s0] sm:$0xff]   ;;  %v1293_v5 = vld [vmem:[%s1806_s0 + $0x8] sm:$0xff]   ;;  %v1295_v7 = vld [vmem:[%s1806_s0 + $0x10] sm:$0xff]  }
   0x3   :  { %1213 = vmatpush3.bf16.msra.mxu0 %v1288_v0  ;;  %1285 = vmatpush3.bf16.msra.mxu1 %v1288_v0  ;;  %v1292_v4 = vld [vmem:[%s1806_s0 + $0x80] sm:$0xff]   ;;  %v1294_v6 = vld [vmem:[%s1806_s0 + $0x88] sm:$0xff]   ;;  %v1296_v8 = vld [vmem:[%s1806_s0 + $0x90] sm:$0xff]  }
   0x4   :  { %1214 = vmatprep.subr.bf16.mxu0 %v1289_v1  ;;  %1283 = vmatprep.subr.bf16.mxu1 %v1289_v1  ;;  %v1297_v9 = vld [vmem:[%s1806_s0 + $0x18] sm:$0xff]   ;;  %v1299_v11 = vld [vmem:[%s1806_s0 + $0x20] sm:$0xff]   ;;  %v1301_v13 = vld [vmem:[%s1806_s0 + $0x28] sm:$0xff]  }
   0x5   :  { %1218 = vmatprep.mubr.msk.bf16.mxu0 %vm270_vm0, %v1291_v3  ;;  %1250 = vmatprep.mubr.msk.bf16.mxu1 %vm270_vm0, %v1292_v4  ;;  %v1298_v10 = vld [vmem:[%s1806_s0 + $0x98] sm:$0xff]   ;;  %v1300_v12 = vld [vmem:[%s1806_s0 + $0xa0] sm:$0xff]   ;;  %v1302_v14 = vld [vmem:[%s1806_s0 + $0xa8] sm:$0xff]  }
   0x6   :  { %v1303_v15 = vld [vmem:[%s1806_s0 + $0x30] sm:$0xff]   ;;  %v1305_v17 = vld [vmem:[%s1806_s0 + $0x38] sm:$0xff]   ;;  %v1307_v19 = vld [vmem:[%s1806_s0 + $0x40] sm:$0xff]  }
   0x7   :  { %1215 = vmatpush3.bf16.msra.mxu0 %v1289_v1  ;;  %1286 = vmatpush3.bf16.msra.mxu1 %v1289_v1  ;;  %v1304_v16 = vld [vmem:[%s1806_s0 + $0xb0] sm:$0xff]   ;;  %v1306_v18 = vld [vmem:[%s1806_s0 + $0xb8] sm:$0xff]   ;;  %v1308_v20 = vld [vmem:[%s1806_s0 + $0xc0] sm:$0xff]  }
   0x8   :  { %1216 = vmatprep.subr.bf16.mxu0 %v1290_v2  ;;  %1284 = vmatprep.subr.bf16.mxu1 %v1290_v2  ;;  %v1309_v21 = vld [vmem:[%s1806_s0 + $0x48] sm:$0xff]   ;;  %v1311_v23 = vld [vmem:[%s1806_s0 + $0x50] sm:$0xff]   ;;  %v1313_v25 = vld [vmem:[%s1806_s0 + $0x58] sm:$0xff]  }
   0x9   :  { %v1310_v22 = vld [vmem:[%s1806_s0 + $0xc8] sm:$0xff]   ;;  %v1312_v24 = vld [vmem:[%s1806_s0 + $0xd0] sm:$0xff]   ;;  %v1314_v26 = vld [vmem:[%s1806_s0 + $0xd8] sm:$0xff]  }
   0xa   :  { %v1315_v27 = vld [vmem:[%s1806_s0 + $0x60] sm:$0xff]   ;;  %v1317_v29 = vld [vmem:[%s1806_s0 + $0x68] sm:$0xff]   ;;  %v1319_v31 = vld [vmem:[%s1806_s0 + $0x70] sm:$0xff]  }
   0xb   :  { %1217 = vmatpush3.bf16.msra.mxu0 %v1290_v2  ;;  %1287 = vmatpush3.bf16.msra.mxu1 %v1290_v2  ;;  %v1316_v28 = vld [vmem:[%s1806_s0 + $0xe0] sm:$0xff]   ;;  %v1318_v30 = vld [vmem:[%s1806_s0 + $0xe8] sm:$0xff]   ;;  %v1320_v32 = vld [vmem:[%s1806_s0 + $0xf0] sm:$0xff]  }
   0xc   :  { %v1321_v33 = vld [vmem:[%s1806_s0 + $0x78] sm:$0xff]   ;;  %v1483_v35 = vld [vmem:[%s1807_s2] ss:$0 sm:$0xff] }
   0xd   :  { %v1322_v34 = vld [vmem:[%s1806_s0 + $0xf8] sm:$0xff]  }
   0xe   :  { %1219 = vmatmul.mubr.msk.bf16.vlgmr.msra.gmra.mxu0 %vm270_vm0, %v1293_v5  ;;  %1251 = vmatmul.mubr.msk.bf16.vlgmr.msra.gmra.mxu1 %vm270_vm0, %v1294_v6 }
   0xf   :  { %1222 = vmatprep.mubr.msk.bf16.mxu0 %vm270_vm0, %v1295_v7  ;;  %1254 = vmatprep.mubr.msk.bf16.mxu1 %vm270_vm0, %v1296_v8 }
  0x16   :  { %1223 = vmatmul.mubr.msk.bf16.gmra.mxu0 %vm270_vm0, %v1297_v9  ;;  %1255 = vmatmul.mubr.msk.bf16.gmra.mxu1 %vm270_vm0, %v1298_v10 }
  0x17   :  { %1226 = vmatprep.mubr.msk.bf16.mxu0 %vm270_vm0, %v1299_v11  ;;  %1258 = vmatprep.mubr.msk.bf16.mxu1 %vm270_vm0, %v1300_v12 }
  0x1e   :  { %1227 = vmatmul.mubr.msk.bf16.gmra.mxu0 %vm270_vm0, %v1301_v13  ;;  %1259 = vmatmul.mubr.msk.bf16.gmra.mxu1 %vm270_vm0, %v1302_v14 }
  0x1f   :  { %1230 = vmatprep.mubr.msk.bf16.mxu0 %vm270_vm0, %v1303_v15  ;;  %1262 = vmatprep.mubr.msk.bf16.mxu1 %vm270_vm0, %v1304_v16 }
  0x26   :  { %1231 = vmatmul.mubr.msk.bf16.gmra.mxu0 %vm270_vm0, %v1305_v17  ;;  %1263 = vmatmul.mubr.msk.bf16.gmra.mxu1 %vm270_vm0, %v1306_v18 }
  0x27   :  { %1234 = vmatprep.mubr.msk.bf16.mxu0 %vm270_vm0, %v1307_v19  ;;  %1266 = vmatprep.mubr.msk.bf16.mxu1 %vm270_vm0, %v1308_v20 }
  0x2e   :  { %1235 = vmatmul.mubr.msk.bf16.gmra.mxu0 %vm270_vm0, %v1309_v21  ;;  %1267 = vmatmul.mubr.msk.bf16.gmra.mxu1 %vm270_vm0, %v1310_v22 }
  0x2f   :  { %1238 = vmatprep.mubr.msk.bf16.mxu0 %vm270_vm0, %v1311_v23  ;;  %1270 = vmatprep.mubr.msk.bf16.mxu1 %vm270_vm0, %v1312_v24 }
  0x36   :  { %1239 = vmatmul.mubr.msk.bf16.gmra.mxu0 %vm270_vm0, %v1313_v25  ;;  %1271 = vmatmul.mubr.msk.bf16.gmra.mxu1 %vm270_vm0, %v1314_v26 }
  0x37   :  { %1242 = vmatprep.mubr.msk.bf16.mxu0 %vm270_vm0, %v1315_v27  ;;  %1274 = vmatprep.mubr.msk.bf16.mxu1 %vm270_vm0, %v1316_v28 }
  0x3e   :  { %1243 = vmatmul.mubr.msk.bf16.gmra.mxu0 %vm270_vm0, %v1317_v29  ;;  %1275 = vmatmul.mubr.msk.bf16.gmra.mxu1 %vm270_vm0, %v1318_v30 }
  0x3f   :  { %1246 = vmatprep.mubr.msk.bf16.mxu0 %vm270_vm0, %v1319_v31  ;;  %1278 = vmatprep.mubr.msk.bf16.mxu1 %vm270_vm0, %v1320_v32 }
  0x46   :  { %1247 = vmatmul.mubr.msk.bf16.gmra.mxu0 %vm270_vm0, %v1321_v33  ;;  %1279 = vmatmul.mubr.msk.bf16.gmra.mxu1 %vm270_vm0, %v1322_v34 }
  0xce   :  { %v1220_v36 = vpop.f32.mrf.mxu0  ;;  %v1252_v37 = vpop.f32.mrf.mxu1 }
  0xcf   :  { %v410_v38 = vadd.f32 %v1220_v36, %v1483_v35  ;;  %v538_v39 = vadd.f32 %v1252_v37, %v1483_v35 }
  0xd0   :  { %v401_v40 = vpop.f32.mrf.mxu0  ;;  %v529_v41 = vpop.f32.mrf.mxu1 }
  0xd1   :  { %v1115_v42 = vpack.c.bf16 %v410_v38, %v410_v38  ;;  %v1147_v43 = vpack.c.bf16 %v538_v39, %v538_v39  ;;  %v402_v44 = vadd.f32 %v1483_v35, %v401_v40  ;;  %v530_v45 = vadd.f32 %v1483_v35, %v529_v41 }
  0xd2   :  { %v1221_v46 = vpop.f32.mrf.mxu0  ;;  %v1253_v47 = vpop.f32.mrf.mxu1 }
  0xd3   :  { %915 = vst.msk [vmem:[%s1808_s3 + $0x8] sm:$0xf] %vm912_vm1, %v1115_v42  ;;  %947 = vst.msk [vmem:[%s1808_s3 + $0x88] sm:$0xf] %vm912_vm1, %v1147_v43  ;;  %v1113_v48 = vpack.c.bf16 %v402_v44, %v402_v44  ;;  %v1145_v49 = vpack.c.bf16 %v530_v45, %v530_v45  ;;  %v413_v50 = vadd.f32 %v1221_v46, %v1483_v35 }
  0xd4   :  { %v541_v51 = vadd.f32 %v1253_v47, %v1483_v35  ;;  %v404_v52 = vpop.f32.mrf.mxu0  ;;  %v532_v53 = vpop.f32.mrf.mxu1 }
  0xd5   :  { %913 = vst.msk [vmem:[%s1808_s3] sm:$0xf] %vm912_vm1, %v1113_v48  ;;  %945 = vst.msk [vmem:[%s1808_s3 + $0x80] sm:$0xf] %vm912_vm1, %v1145_v49  ;;  %v1116_v54 = vpack.c.bf16 %v413_v50, %v413_v50  ;;  %v405_v56 = vadd.f32 %v1483_v35, %v404_v52  ;;  %v533_v57 = vadd.f32 %v1483_v35, %v532_v53 }
  0xd6   :  { %v1148_v55 = vpack.c.bf16 %v541_v51, %v541_v51  ;;  %v1224_v58 = vpop.f32.mrf.mxu0  ;;  %v1256_v59 = vpop.f32.mrf.mxu1 }
  0xd7   :  { %916 = vst.msk [vmem:[%s1808_s3 + $0xc] sm:$0xf] %vm912_vm1, %v1116_v54  ;;  %v1114_v60 = vpack.c.bf16 %v405_v56, %v405_v56  ;;  %v1146_v61 = vpack.c.bf16 %v533_v57, %v533_v57  ;;  %v426_v62 = vadd.f32 %v1224_v58, %v1483_v35  ;;  %v554_v63 = vadd.f32 %v1256_v59, %v1483_v35 }
  0xd8   :  { %948 = vst.msk [vmem:[%s1808_s3 + $0x8c] sm:$0xf] %vm912_vm1, %v1148_v55  ;;  %v417_v0 = vpop.f32.mrf.mxu0  ;;  %v545_v1 = vpop.f32.mrf.mxu1 }
  0xd9   :  { %914 = vst.msk [vmem:[%s1808_s3 + $0x4] sm:$0xf] %vm912_vm1, %v1114_v60  ;;  %946 = vst.msk [vmem:[%s1808_s3 + $0x84] sm:$0xf] %vm912_vm1, %v1146_v61  ;;  %v1119_v2 = vpack.c.bf16 %v426_v62, %v426_v62  ;;  %v1151_v3 = vpack.c.bf16 %v554_v63, %v554_v63  ;;  %v418_v4 = vadd.f32 %v1483_v35, %v417_v0 }
  0xda   :  { %v546_v5 = vadd.f32 %v1483_v35, %v545_v1  ;;  %v1225_v6 = vpop.f32.mrf.mxu0  ;;  %v1257_v7 = vpop.f32.mrf.mxu1 }
  0xdb   :  { %919 = vst.msk [vmem:[%s1808_s3 + $0x18] sm:$0xf] %vm912_vm1, %v1119_v2  ;;  %951 = vst.msk [vmem:[%s1808_s3 + $0x98] sm:$0xf] %vm912_vm1, %v1151_v3  ;;  %v1117_v8 = vpack.c.bf16 %v418_v4, %v418_v4  ;;  %v429_v10 = vadd.f32 %v1225_v6, %v1483_v35  ;;  %v557_v11 = vadd.f32 %v1257_v7, %v1483_v35 }
  0xdc   :  { %v1149_v9 = vpack.c.bf16 %v546_v5, %v546_v5  ;;  %v420_v12 = vpop.f32.mrf.mxu0  ;;  %v548_v13 = vpop.f32.mrf.mxu1 }
  0xdd   :  { %917 = vst.msk [vmem:[%s1808_s3 + $0x10] sm:$0xf] %vm912_vm1, %v1117_v8  ;;  %v1120_v14 = vpack.c.bf16 %v429_v10, %v429_v10  ;;  %v1152_v15 = vpack.c.bf16 %v557_v11, %v557_v11  ;;  %v421_v16 = vadd.f32 %v1483_v35, %v420_v12  ;;  %v549_v17 = vadd.f32 %v1483_v35, %v548_v13 }
  0xde   :  { %949 = vst.msk [vmem:[%s1808_s3 + $0x90] sm:$0xf] %vm912_vm1, %v1149_v9  ;;  %v1228_v18 = vpop.f32.mrf.mxu0  ;;  %v1260_v19 = vpop.f32.mrf.mxu1 }
  0xdf   :  { %920 = vst.msk [vmem:[%s1808_s3 + $0x1c] sm:$0xf] %vm912_vm1, %v1120_v14  ;;  %952 = vst.msk [vmem:[%s1808_s3 + $0x9c] sm:$0xf] %vm912_vm1, %v1152_v15  ;;  %v1118_v20 = vpack.c.bf16 %v421_v16, %v421_v16  ;;  %v1150_v21 = vpack.c.bf16 %v549_v17, %v549_v17  ;;  %v442_v22 = vadd.f32 %v1228_v18, %v1483_v35 }
  0xe0   :  { %v570_v23 = vadd.f32 %v1260_v19, %v1483_v35  ;;  %v433_v24 = vpop.f32.mrf.mxu0  ;;  %v561_v25 = vpop.f32.mrf.mxu1 }
  0xe1   :  { %918 = vst.msk [vmem:[%s1808_s3 + $0x14] sm:$0xf] %vm912_vm1, %v1118_v20  ;;  %950 = vst.msk [vmem:[%s1808_s3 + $0x94] sm:$0xf] %vm912_vm1, %v1150_v21  ;;  %v1123_v26 = vpack.c.bf16 %v442_v22, %v442_v22  ;;  %v434_v28 = vadd.f32 %v1483_v35, %v433_v24  ;;  %v562_v29 = vadd.f32 %v1483_v35, %v561_v25 }
  0xe2   :  { %v1155_v27 = vpack.c.bf16 %v570_v23, %v570_v23  ;;  %v1229_v30 = vpop.f32.mrf.mxu0  ;;  %v1261_v31 = vpop.f32.mrf.mxu1 }
  0xe3   :  { %923 = vst.msk [vmem:[%s1808_s3 + $0x28] sm:$0xf] %vm912_vm1, %v1123_v26  ;;  %v1121_v32 = vpack.c.bf16 %v434_v28, %v434_v28  ;;  %v1153_v33 = vpack.c.bf16 %v562_v29, %v562_v29  ;;  %v445_v34 = vadd.f32 %v1229_v30, %v1483_v35  ;;  %v573_v36 = vadd.f32 %v1261_v31, %v1483_v35 }
  0xe4   :  { %955 = vst.msk [vmem:[%s1808_s3 + $0xa8] sm:$0xf] %vm912_vm1, %v1155_v27  ;;  %v436_v37 = vpop.f32.mrf.mxu0  ;;  %v564_v38 = vpop.f32.mrf.mxu1 }
  0xe5   :  { %921 = vst.msk [vmem:[%s1808_s3 + $0x20] sm:$0xf] %vm912_vm1, %v1121_v32  ;;  %953 = vst.msk [vmem:[%s1808_s3 + $0xa0] sm:$0xf] %vm912_vm1, %v1153_v33  ;;  %v1124_v39 = vpack.c.bf16 %v445_v34, %v445_v34  ;;  %v1156_v40 = vpack.c.bf16 %v573_v36, %v573_v36  ;;  %v437_v41 = vadd.f32 %v1483_v35, %v436_v37 }
  0xe6   :  { %v565_v42 = vadd.f32 %v1483_v35, %v564_v38  ;;  %v1232_v43 = vpop.f32.mrf.mxu0  ;;  %v1264_v44 = vpop.f32.mrf.mxu1 }
  0xe7   :  { %924 = vst.msk [vmem:[%s1808_s3 + $0x2c] sm:$0xf] %vm912_vm1, %v1124_v39  ;;  %956 = vst.msk [vmem:[%s1808_s3 + $0xac] sm:$0xf] %vm912_vm1, %v1156_v40  ;;  %v1122_v45 = vpack.c.bf16 %v437_v41, %v437_v41  ;;  %v458_v47 = vadd.f32 %v1232_v43, %v1483_v35  ;;  %v586_v48 = vadd.f32 %v1264_v44, %v1483_v35 }
  0xe8   :  { %v1154_v46 = vpack.c.bf16 %v565_v42, %v565_v42  ;;  %v449_v49 = vpop.f32.mrf.mxu0  ;;  %v577_v50 = vpop.f32.mrf.mxu1 }
  0xe9   :  { %922 = vst.msk [vmem:[%s1808_s3 + $0x24] sm:$0xf] %vm912_vm1, %v1122_v45  ;;  %v1127_v51 = vpack.c.bf16 %v458_v47, %v458_v47  ;;  %v1159_v52 = vpack.c.bf16 %v586_v48, %v586_v48  ;;  %v450_v53 = vadd.f32 %v1483_v35, %v449_v49  ;;  %v578_v54 = vadd.f32 %v1483_v35, %v577_v50 }
  0xea   :  { %954 = vst.msk [vmem:[%s1808_s3 + $0xa4] sm:$0xf] %vm912_vm1, %v1154_v46  ;;  %v1233_v55 = vpop.f32.mrf.mxu0  ;;  %v1265_v56 = vpop.f32.mrf.mxu1 }
  0xeb   :  { %927 = vst.msk [vmem:[%s1808_s3 + $0x38] sm:$0xf] %vm912_vm1, %v1127_v51  ;;  %959 = vst.msk [vmem:[%s1808_s3 + $0xb8] sm:$0xf] %vm912_vm1, %v1159_v52  ;;  %v1125_v57 = vpack.c.bf16 %v450_v53, %v450_v53  ;;  %v1157_v58 = vpack.c.bf16 %v578_v54, %v578_v54  ;;  %v461_v59 = vadd.f32 %v1233_v55, %v1483_v35 }
  0xec   :  { %v589_v60 = vadd.f32 %v1265_v56, %v1483_v35  ;;  %v452_v61 = vpop.f32.mrf.mxu0  ;;  %v580_v62 = vpop.f32.mrf.mxu1 }
  0xed   :  { %925 = vst.msk [vmem:[%s1808_s3 + $0x30] sm:$0xf] %vm912_vm1, %v1125_v57  ;;  %957 = vst.msk [vmem:[%s1808_s3 + $0xb0] sm:$0xf] %vm912_vm1, %v1157_v58  ;;  %v1128_v63 = vpack.c.bf16 %v461_v59, %v461_v59  ;;  %v453_v1 = vadd.f32 %v1483_v35, %v452_v61  ;;  %v581_v2 = vadd.f32 %v1483_v35, %v580_v62 }
  0xee   :  { %v1160_v0 = vpack.c.bf16 %v589_v60, %v589_v60  ;;  %v1236_v3 = vpop.f32.mrf.mxu0  ;;  %v1268_v4 = vpop.f32.mrf.mxu1 }
  0xef   :  { %928 = vst.msk [vmem:[%s1808_s3 + $0x3c] sm:$0xf] %vm912_vm1, %v1128_v63  ;;  %v1126_v5 = vpack.c.bf16 %v453_v1, %v453_v1  ;;  %v1158_v6 = vpack.c.bf16 %v581_v2, %v581_v2  ;;  %v474_v7 = vadd.f32 %v1236_v3, %v1483_v35  ;;  %v602_v8 = vadd.f32 %v1268_v4, %v1483_v35 }
  0xf0   :  { %960 = vst.msk [vmem:[%s1808_s3 + $0xbc] sm:$0xf] %vm912_vm1, %v1160_v0  ;;  %v465_v9 = vpop.f32.mrf.mxu0  ;;  %v593_v10 = vpop.f32.mrf.mxu1 }
  0xf1   :  { %926 = vst.msk [vmem:[%s1808_s3 + $0x34] sm:$0xf] %vm912_vm1, %v1126_v5  ;;  %958 = vst.msk [vmem:[%s1808_s3 + $0xb4] sm:$0xf] %vm912_vm1, %v1158_v6  ;;  %v1131_v11 = vpack.c.bf16 %v474_v7, %v474_v7  ;;  %v1163_v12 = vpack.c.bf16 %v602_v8, %v602_v8  ;;  %v466_v13 = vadd.f32 %v1483_v35, %v465_v9 }
  0xf2   :  { %v594_v14 = vadd.f32 %v1483_v35, %v593_v10  ;;  %v1237_v15 = vpop.f32.mrf.mxu0  ;;  %v1269_v16 = vpop.f32.mrf.mxu1 }
  0xf3   :  { %931 = vst.msk [vmem:[%s1808_s3 + $0x48] sm:$0xf] %vm912_vm1, %v1131_v11  ;;  %963 = vst.msk [vmem:[%s1808_s3 + $0xc8] sm:$0xf] %vm912_vm1, %v1163_v12  ;;  %v1129_v17 = vpack.c.bf16 %v466_v13, %v466_v13  ;;  %v477_v19 = vadd.f32 %v1237_v15, %v1483_v35  ;;  %v605_v20 = vadd.f32 %v1269_v16, %v1483_v35 }
  0xf4   :  { %v1161_v18 = vpack.c.bf16 %v594_v14, %v594_v14  ;;  %v468_v21 = vpop.f32.mrf.mxu0  ;;  %v596_v22 = vpop.f32.mrf.mxu1 }
  0xf5   :  { %929 = vst.msk [vmem:[%s1808_s3 + $0x40] sm:$0xf] %vm912_vm1, %v1129_v17  ;;  %v1132_v23 = vpack.c.bf16 %v477_v19, %v477_v19  ;;  %v1164_v24 = vpack.c.bf16 %v605_v20, %v605_v20  ;;  %v469_v25 = vadd.f32 %v1483_v35, %v468_v21  ;;  %v597_v26 = vadd.f32 %v1483_v35, %v596_v22 }
  0xf6   :  { %961 = vst.msk [vmem:[%s1808_s3 + $0xc0] sm:$0xf] %vm912_vm1, %v1161_v18  ;;  %v1240_v27 = vpop.f32.mrf.mxu0  ;;  %v1272_v28 = vpop.f32.mrf.mxu1 }
  0xf7   :  { %932 = vst.msk [vmem:[%s1808_s3 + $0x4c] sm:$0xf] %vm912_vm1, %v1132_v23  ;;  %964 = vst.msk [vmem:[%s1808_s3 + $0xcc] sm:$0xf] %vm912_vm1, %v1164_v24  ;;  %v1130_v29 = vpack.c.bf16 %v469_v25, %v469_v25  ;;  %v1162_v30 = vpack.c.bf16 %v597_v26, %v597_v26  ;;  %v490_v31 = vadd.f32 %v1240_v27, %v1483_v35 }
  0xf8   :  { %v618_v32 = vadd.f32 %v1272_v28, %v1483_v35  ;;  %v481_v33 = vpop.f32.mrf.mxu0  ;;  %v609_v34 = vpop.f32.mrf.mxu1 }
  0xf9   :  { %930 = vst.msk [vmem:[%s1808_s3 + $0x44] sm:$0xf] %vm912_vm1, %v1130_v29  ;;  %962 = vst.msk [vmem:[%s1808_s3 + $0xc4] sm:$0xf] %vm912_vm1, %v1162_v30  ;;  %v1135_v36 = vpack.c.bf16 %v490_v31, %v490_v31  ;;  %v482_v38 = vadd.f32 %v1483_v35, %v481_v33  ;;  %v610_v39 = vadd.f32 %v1483_v35, %v609_v34 }
  0xfa   :  { %v1167_v37 = vpack.c.bf16 %v618_v32, %v618_v32  ;;  %v1241_v40 = vpop.f32.mrf.mxu0  ;;  %v1273_v41 = vpop.f32.mrf.mxu1 }
  0xfb   :  { %935 = vst.msk [vmem:[%s1808_s3 + $0x58] sm:$0xf] %vm912_vm1, %v1135_v36  ;;  %v1133_v42 = vpack.c.bf16 %v482_v38, %v482_v38  ;;  %v1165_v43 = vpack.c.bf16 %v610_v39, %v610_v39  ;;  %v493_v44 = vadd.f32 %v1241_v40, %v1483_v35  ;;  %v621_v45 = vadd.f32 %v1273_v41, %v1483_v35 }
  0xfc   :  { %967 = vst.msk [vmem:[%s1808_s3 + $0xd8] sm:$0xf] %vm912_vm1, %v1167_v37  ;;  %v484_v46 = vpop.f32.mrf.mxu0  ;;  %v612_v47 = vpop.f32.mrf.mxu1 }
  0xfd   :  { %933 = vst.msk [vmem:[%s1808_s3 + $0x50] sm:$0xf] %vm912_vm1, %v1133_v42  ;;  %965 = vst.msk [vmem:[%s1808_s3 + $0xd0] sm:$0xf] %vm912_vm1, %v1165_v43  ;;  %v1136_v48 = vpack.c.bf16 %v493_v44, %v493_v44  ;;  %v1168_v49 = vpack.c.bf16 %v621_v45, %v621_v45  ;;  %v485_v50 = vadd.f32 %v1483_v35, %v484_v46 }
  0xfe   :  { %v613_v51 = vadd.f32 %v1483_v35, %v612_v47  ;;  %v1244_v52 = vpop.f32.mrf.mxu0  ;;  %v1276_v53 = vpop.f32.mrf.mxu1 }
  0xff   :  { %936 = vst.msk [vmem:[%s1808_s3 + $0x5c] sm:$0xf] %vm912_vm1, %v1136_v48  ;;  %968 = vst.msk [vmem:[%s1808_s3 + $0xdc] sm:$0xf] %vm912_vm1, %v1168_v49  ;;  %v1134_v54 = vpack.c.bf16 %v485_v50, %v485_v50  ;;  %v506_v56 = vadd.f32 %v1244_v52, %v1483_v35  ;;  %v634_v57 = vadd.f32 %v1276_v53, %v1483_v35 }
 0x100   :  { %v1166_v55 = vpack.c.bf16 %v613_v51, %v613_v51  ;;  %v497_v58 = vpop.f32.mrf.mxu0  ;;  %v625_v59 = vpop.f32.mrf.mxu1 }
 0x101   :  { %934 = vst.msk [vmem:[%s1808_s3 + $0x54] sm:$0xf] %vm912_vm1, %v1134_v54  ;;  %v1139_v60 = vpack.c.bf16 %v506_v56, %v506_v56  ;;  %v1171_v61 = vpack.c.bf16 %v634_v57, %v634_v57  ;;  %v498_v62 = vadd.f32 %v1483_v35, %v497_v58  ;;  %v626_v63 = vadd.f32 %v1483_v35, %v625_v59 }
 0x102   :  { %966 = vst.msk [vmem:[%s1808_s3 + $0xd4] sm:$0xf] %vm912_vm1, %v1166_v55  ;;  %v1245_v0 = vpop.f32.mrf.mxu0  ;;  %v1277_v1 = vpop.f32.mrf.mxu1 }
 0x103   :  { %939 = vst.msk [vmem:[%s1808_s3 + $0x68] sm:$0xf] %vm912_vm1, %v1139_v60  ;;  %971 = vst.msk [vmem:[%s1808_s3 + $0xe8] sm:$0xf] %vm912_vm1, %v1171_v61  ;;  %v1137_v2 = vpack.c.bf16 %v498_v62, %v498_v62  ;;  %v1169_v3 = vpack.c.bf16 %v626_v63, %v626_v63  ;;  %v509_v4 = vadd.f32 %v1245_v0, %v1483_v35 }
 0x104   :  { %v637_v5 = vadd.f32 %v1277_v1, %v1483_v35  ;;  %v500_v6 = vpop.f32.mrf.mxu0  ;;  %v628_v7 = vpop.f32.mrf.mxu1 }
 0x105   :  { %937 = vst.msk [vmem:[%s1808_s3 + $0x60] sm:$0xf] %vm912_vm1, %v1137_v2  ;;  %969 = vst.msk [vmem:[%s1808_s3 + $0xe0] sm:$0xf] %vm912_vm1, %v1169_v3  ;;  %v1140_v8 = vpack.c.bf16 %v509_v4, %v509_v4  ;;  %v501_v10 = vadd.f32 %v1483_v35, %v500_v6  ;;  %v629_v11 = vadd.f32 %v1483_v35, %v628_v7 }
 0x106   :  { %v1172_v9 = vpack.c.bf16 %v637_v5, %v637_v5  ;;  %v1248_v12 = vpop.f32.mrf.mxu0  ;;  %v1280_v13 = vpop.f32.mrf.mxu1 }
 0x107   :  { %940 = vst.msk [vmem:[%s1808_s3 + $0x6c] sm:$0xf] %vm912_vm1, %v1140_v8  ;;  %v1138_v14 = vpack.c.bf16 %v501_v10, %v501_v10  ;;  %v1170_v15 = vpack.c.bf16 %v629_v11, %v629_v11  ;;  %v522_v16 = vadd.f32 %v1248_v12, %v1483_v35  ;;  %v650_v17 = vadd.f32 %v1280_v13, %v1483_v35 }
 0x108   :  { %972 = vst.msk [vmem:[%s1808_s3 + $0xec] sm:$0xf] %vm912_vm1, %v1172_v9  ;;  %v513_v18 = vpop.f32.mrf.mxu0  ;;  %v641_v19 = vpop.f32.mrf.mxu1 }
 0x109   :  { %938 = vst.msk [vmem:[%s1808_s3 + $0x64] sm:$0xf] %vm912_vm1, %v1138_v14  ;;  %970 = vst.msk [vmem:[%s1808_s3 + $0xe4] sm:$0xf] %vm912_vm1, %v1170_v15  ;;  %v1143_v20 = vpack.c.bf16 %v522_v16, %v522_v16  ;;  %v1175_v21 = vpack.c.bf16 %v650_v17, %v650_v17  ;;  %v514_v22 = vadd.f32 %v1483_v35, %v513_v18 }
 0x10a   :  { %v642_v23 = vadd.f32 %v1483_v35, %v641_v19  ;;  %v1249_v24 = vpop.f32.mrf.mxu0  ;;  %v1281_v25 = vpop.f32.mrf.mxu1 }
 0x10b   :  { %943 = vst.msk [vmem:[%s1808_s3 + $0x78] sm:$0xf] %vm912_vm1, %v1143_v20  ;;  %975 = vst.msk [vmem:[%s1808_s3 + $0xf8] sm:$0xf] %vm912_vm1, %v1175_v21  ;;  %v1141_v26 = vpack.c.bf16 %v514_v22, %v514_v22  ;;  %v525_v28 = vadd.f32 %v1249_v24, %v1483_v35  ;;  %v653_v29 = vadd.f32 %v1281_v25, %v1483_v35 }
 0x10c   :  { %v1173_v27 = vpack.c.bf16 %v642_v23, %v642_v23  ;;  %v516_v30 = vpop.f32.mrf.mxu0  ;;  %v644_v31 = vpop.f32.mrf.mxu1 }
 0x10d   :  { %941 = vst.msk [vmem:[%s1808_s3 + $0x70] sm:$0xf] %vm912_vm1, %v1141_v26  ;;  %v1144_v32 = vpack.c.bf16 %v525_v28, %v525_v28  ;;  %v1176_v33 = vpack.c.bf16 %v653_v29, %v653_v29  ;;  %v517_v34 = vadd.f32 %v1483_v35, %v516_v30  ;;  %v645_v36 = vadd.f32 %v1483_v35, %v644_v31 }
 0x10e   :  { %973 = vst.msk [vmem:[%s1808_s3 + $0xf0] sm:$0xf] %vm912_vm1, %v1173_v27 }
 0x10f   :  { %944 = vst.msk [vmem:[%s1808_s3 + $0x7c] sm:$0xf] %vm912_vm1, %v1144_v32  ;;  %976 = vst.msk [vmem:[%s1808_s3 + $0xfc] sm:$0xf] %vm912_vm1, %v1176_v33  ;;  %v1142_v37 = vpack.c.bf16 %v517_v34, %v517_v34  ;;  %v1174_v38 = vpack.c.bf16 %v645_v36, %v645_v36 }
 0x111   :  { %942 = vst.msk [vmem:[%s1808_s3 + $0x74] sm:$0xf] %vm912_vm1, %v1142_v37  ;;  %974 = vst.msk [vmem:[%s1808_s3 + $0xf4] sm:$0xf] %vm912_vm1, %v1174_v38 }

// kernel: convnet_forward.7
= control target key start
LH: loop header
LB: loop body
LE: loop exit
PB: predicated region body
PF: predicated region fallthrough
CT: control target
= control target key end

     0   :  { %vm728_vm0 = vcmask 519168   ;;  %s1351_s1 = inlined_call_operand.vmem [shape: bf16[512,64], index: 1, kind: input, shape index: {}]   ;;  %s1352_s0 = inlined_call_operand.vmem [shape: bf16[128,512], index: 0, kind: input, shape index: {}]   ;;  %s1353_s2 = inlined_call_operand.vmem [shape: f32[1,64], index: 2, kind: input, shape index: {}]   ;;  %s1354_s3 = inlined_call_operand.vmem [shape: bf16[128,64], index: 3, kind: output, shape index: {}]  }
   0x1   :  { %v974_v0 = vld [vmem:[%s1351_s1 + $0x78] sm:$0xff]   ;;  %v978_v4 = vld [vmem:[%s1351_s1 + $0x70] sm:$0xff]   ;;  %v982_v8 = vld [vmem:[%s1351_s1 + $0x68] sm:$0xff]  }
   0x2   :  { %v975_v1 = vld [vmem:[%s1351_s1 + $0xf8] sm:$0xff]   ;;  %846 = vmatprep.subr.bf16.mxu0 %v974_v0  ;;  %v979_v5 = vld [vmem:[%s1351_s1 + $0xf0] sm:$0xff]   ;;  %v983_v9 = vld [vmem:[%s1351_s1 + $0xe8] sm:$0xff]  }
   0x3   :  { %v976_v2 = vld [vmem:[%s1351_s1 + $0x38] sm:$0xff]   ;;  %910 = vmatprep.subr.bf16.mxu1 %v975_v1  ;;  %v980_v6 = vld [vmem:[%s1351_s1 + $0x30] sm:$0xff]   ;;  %v984_v10 = vld [vmem:[%s1351_s1 + $0x28] sm:$0xff]  }
   0x4   :  { %v977_v3 = vld [vmem:[%s1351_s1 + $0xb8] sm:$0xff]   ;;  %847 = vmatpush3.bf16.msra.mxu0 %v976_v2  ;;  %v981_v7 = vld [vmem:[%s1351_s1 + $0xb0] sm:$0xff]   ;;  %v985_v11 = vld [vmem:[%s1351_s1 + $0xa8] sm:$0xff]  }
   0x5   :  { %911 = vmatpush3.bf16.msra.mxu1 %v977_v3  ;;  %848 = vmatprep.subr.bf16.mxu0 %v978_v4  ;;  %v986_v12 = vld [vmem:[%s1351_s1 + $0x60] sm:$0xff]   ;;  %v990_v16 = vld [vmem:[%s1351_s1 + $0x58] sm:$0xff]   ;;  %v994_v20 = vld [vmem:[%s1351_s1 + $0x50] sm:$0xff]  }
   0x6   :  { %912 = vmatprep.subr.bf16.mxu1 %v979_v5  ;;  %v987_v13 = vld [vmem:[%s1351_s1 + $0xe0] sm:$0xff]   ;;  %v991_v17 = vld [vmem:[%s1351_s1 + $0xd8] sm:$0xff]   ;;  %v995_v21 = vld [vmem:[%s1351_s1 + $0xd0] sm:$0xff]  }
   0x7   :  { %v988_v14 = vld [vmem:[%s1351_s1 + $0x20] sm:$0xff]   ;;  %v992_v18 = vld [vmem:[%s1351_s1 + $0x18] sm:$0xff]   ;;  %v996_v22 = vld [vmem:[%s1351_s1 + $0x10] sm:$0xff]  }
   0x8   :  { %849 = vmatpush3.bf16.msra.mxu0 %v980_v6  ;;  %v989_v15 = vld [vmem:[%s1351_s1 + $0xa0] sm:$0xff]   ;;  %v993_v19 = vld [vmem:[%s1351_s1 + $0x98] sm:$0xff]   ;;  %v997_v23 = vld [vmem:[%s1351_s1 + $0x90] sm:$0xff]  }
   0x9   :  { %913 = vmatpush3.bf16.msra.mxu1 %v981_v7  ;;  %850 = vmatprep.subr.bf16.mxu0 %v982_v8  ;;  %v998_v24 = vld [vmem:[%s1351_s1 + $0x48] sm:$0xff]   ;;  %v1002_v28 = vld [vmem:[%s1351_s1 + $0x40] sm:$0xff]  }
   0xa   :  { %914 = vmatprep.subr.bf16.mxu1 %v983_v9  ;;  %v999_v25 = vld [vmem:[%s1351_s1 + $0xc8] sm:$0xff]   ;;  %v1003_v29 = vld [vmem:[%s1351_s1 + $0xc0] sm:$0xff]  }
   0xb   :  { %v1000_v26 = vld [vmem:[%s1351_s1 + $0x8] sm:$0xff]   ;;  %v1004_v30 = vld [vmem:[%s1351_s1] sm:$0xff]  }
   0xc   :  { %851 = vmatpush3.bf16.msra.mxu0 %v984_v10  ;;  %v1001_v27 = vld [vmem:[%s1351_s1 + $0x88] sm:$0xff]   ;;  %v1005_v31 = vld [vmem:[%s1351_s1 + $0x80] sm:$0xff]  }
   0xd   :  { %915 = vmatpush3.bf16.msra.mxu1 %v985_v11  ;;  %852 = vmatprep.subr.bf16.mxu0 %v986_v12  ;;  %v1006_v32 = vld [vmem:[%s1352_s0] ss:$16 sps:$4 sm:$0xff]   ;;  %v1008_v33 = vld [vmem:[%s1352_s0 + $0x4] ss:$16 sps:$4 sm:$0xff]   ;;  %v1009_v34 = vld [vmem:[%s1352_s0 + $0x8] ss:$16 sps:$4 sm:$0xff]  }
   0xe   :  { %916 = vmatprep.subr.bf16.mxu1 %v987_v13  ;;  %v1011_v35 = vld [vmem:[%s1352_s0 + $0xc] ss:$16 sps:$4 sm:$0xff]   ;;  %502 = vmatprep.mubr.bf16.mxu0 %v1008_v33  ;;  %v1012_v36 = vld [vmem:[%s1352_s0 + $0x24] ss:$16 sps:$4 sm:$0xff]   ;;  %v1016_v38 = vld [vmem:[%s1352_s0 + $0x20] ss:$16 sps:$4 sm:$0xff]  }
   0xf   :  { %599 = vmatprep.mubr.bf16.mxu1 %v1011_v35  ;;  %v1014_v37 = vld [vmem:[%s1352_s0 + $0x2c] ss:$16 sps:$4 sm:$0xff]   ;;  %v1017_v39 = vld [vmem:[%s1352_s0 + $0x28] ss:$16 sps:$4 sm:$0xff]   ;;  %v1018_v40 = vld [vmem:[%s1352_s0 + $0x44] ss:$16 sps:$4 sm:$0xff]  }
  0x10   :  { %853 = vmatpush3.bf16.msra.mxu0 %v988_v14  ;;  %v1020_v41 = vld [vmem:[%s1352_s0 + $0x4c] ss:$16 sps:$4 sm:$0xff]   ;;  %v1022_v42 = vld [vmem:[%s1352_s0 + $0x40] ss:$16 sps:$4 sm:$0xff]   ;;  %v1023_v43 = vld [vmem:[%s1352_s0 + $0x48] ss:$16 sps:$4 sm:$0xff]  }
  0x11   :  { %917 = vmatpush3.bf16.msra.mxu1 %v989_v15  ;;  %854 = vmatprep.subr.bf16.mxu0 %v990_v16  ;;  %v1024_v44 = vld [vmem:[%s1352_s0 + $0x64] ss:$16 sps:$4 sm:$0xff]   ;;  %v1026_v45 = vld [vmem:[%s1352_s0 + $0x6c] ss:$16 sps:$4 sm:$0xff]   ;;  %v1028_v46 = vld [vmem:[%s1352_s0 + $0x60] ss:$16 sps:$4 sm:$0xff]  }
  0x12   :  { %918 = vmatprep.subr.bf16.mxu1 %v991_v17  ;;  %v1029_v47 = vld [vmem:[%s1352_s0 + $0x68] ss:$16 sps:$4 sm:$0xff]   ;;  %v1030_v48 = vld [vmem:[%s1352_s0 + $0x84] ss:$16 sps:$4 sm:$0xff]   ;;  %v1032_v49 = vld [vmem:[%s1352_s0 + $0x8c] ss:$16 sps:$4 sm:$0xff]  }
  0x13   :  { %v1034_v50 = vld [vmem:[%s1352_s0 + $0x80] ss:$16 sps:$4 sm:$0xff]   ;;  %v1035_v51 = vld [vmem:[%s1352_s0 + $0x88] ss:$16 sps:$4 sm:$0xff]   ;;  %v1036_v52 = vld [vmem:[%s1352_s0 + $0xa4] ss:$16 sps:$4 sm:$0xff]  }
  0x14   :  { %855 = vmatpush3.bf16.msra.mxu0 %v992_v18  ;;  %v1038_v53 = vld [vmem:[%s1352_s0 + $0xac] ss:$16 sps:$4 sm:$0xff]   ;;  %v1040_v54 = vld [vmem:[%s1352_s0 + $0xa0] ss:$16 sps:$4 sm:$0xff]   ;;  %v1041_v55 = vld [vmem:[%s1352_s0 + $0xa8] ss:$16 sps:$4 sm:$0xff]  }
  0x15   :  { %919 = vmatpush3.bf16.msra.mxu1 %v993_v19  ;;  %856 = vmatprep.subr.bf16.mxu0 %v994_v20  ;;  %v1042_v56 = vld [vmem:[%s1352_s0 + $0xc4] ss:$16 sps:$4 sm:$0xff]   ;;  %v1044_v57 = vld [vmem:[%s1352_s0 + $0xcc] ss:$16 sps:$4 sm:$0xff]   ;;  %v1046_v58 = vld [vmem:[%s1352_s0 + $0xc0] ss:$16 sps:$4 sm:$0xff]  }
  0x16   :  { %920 = vmatprep.subr.bf16.mxu1 %v995_v21  ;;  %v1047_v59 = vld [vmem:[%s1352_s0 + $0xc8] ss:$16 sps:$4 sm:$0xff]   ;;  %v1048_v60 = vld [vmem:[%s1352_s0 + $0xe4] ss:$16 sps:$4 sm:$0xff]   ;;  %v1050_v61 = vld [vmem:[%s1352_s0 + $0xec] ss:$16 sps:$4 sm:$0xff]  }
  0x17   :  { %v1052_v62 = vld [vmem:[%s1352_s0 + $0xe0] ss:$16 sps:$4 sm:$0xff]   ;;  %v1053_v63 = vld [vmem:[%s1352_s0 + $0xe8] ss:$16 sps:$4 sm:$0xff]  }
  0x18   :  { %857 = vmatpush3.bf16.msra.mxu0 %v996_v22  ;;  %v1269_v2 = vld [vmem:[%s1353_s2] ss:$0 sm:$0xff] }
  0x19   :  { %921 = vmatpush3.bf16.msra.mxu1 %v997_v23  ;;  %858 = vmatprep.subr.bf16.mxu0 %v998_v24 }
  0x1a   :  { %922 = vmatprep.subr.bf16.mxu1 %v999_v25 }
  0x1c   :  { %859 = vmatpush3.bf16.msra.mxu0 %v1000_v26 }
  0x1d   :  { %923 = vmatpush3.bf16.msra.mxu1 %v1001_v27  ;;  %860 = vmatprep.subr.bf16.mxu0 %v1002_v28 }
  0x1e   :  { %924 = vmatprep.subr.bf16.mxu1 %v1003_v29 }
  0x20   :  { %861 = vmatpush3.bf16.msra.mxu0 %v1004_v30 }
  0x21   :  { %925 = vmatpush3.bf16.msra.mxu1 %v1005_v31 }
  0x23   :  { %503 = vmatmul.mubr.bf16.vlgmr.msra.gmra.mxu0 %v1006_v32 }
  0x24   :  { %600 = vmatmul.mubr.bf16.vlgmr.msra.gmra.mxu1 %v1009_v34  ;;  %510 = vmatprep.mubr.bf16.mxu0 %v1012_v36 }
  0x25   :  { %607 = vmatprep.mubr.bf16.mxu1 %v1014_v37 }
  0x2b   :  { %511 = vmatmul.mubr.bf16.gmra.mxu0 %v1016_v38 }
  0x2c   :  { %608 = vmatmul.mubr.bf16.gmra.mxu1 %v1017_v39  ;;  %518 = vmatprep.mubr.bf16.mxu0 %v1018_v40 }
  0x2d   :  { %615 = vmatprep.mubr.bf16.mxu1 %v1020_v41 }
  0x33   :  { %519 = vmatmul.mubr.bf16.gmra.mxu0 %v1022_v42 }
  0x34   :  { %616 = vmatmul.mubr.bf16.gmra.mxu1 %v1023_v43  ;;  %526 = vmatprep.mubr.bf16.mxu0 %v1024_v44 }
  0x35   :  { %623 = vmatprep.mubr.bf16.mxu1 %v1026_v45 }
  0x3b   :  { %527 = vmatmul.mubr.bf16.gmra.mxu0 %v1028_v46 }
  0x3c   :  { %624 = vmatmul.mubr.bf16.gmra.mxu1 %v1029_v47  ;;  %534 = vmatprep.mubr.bf16.mxu0 %v1030_v48 }
  0x3d   :  { %631 = vmatprep.mubr.bf16.mxu1 %v1032_v49 }
  0x43   :  { %535 = vmatmul.mubr.bf16.gmra.mxu0 %v1034_v50 }
  0x44   :  { %632 = vmatmul.mubr.bf16.gmra.mxu1 %v1035_v51  ;;  %542 = vmatprep.mubr.bf16.mxu0 %v1036_v52 }
  0x45   :  { %639 = vmatprep.mubr.bf16.mxu1 %v1038_v53 }
  0x4b   :  { %543 = vmatmul.mubr.bf16.gmra.mxu0 %v1040_v54 }
  0x4c   :  { %640 = vmatmul.mubr.bf16.gmra.mxu1 %v1041_v55  ;;  %550 = vmatprep.mubr.bf16.mxu0 %v1042_v56 }
  0x4d   :  { %647 = vmatprep.mubr.bf16.mxu1 %v1044_v57 }
  0x53   :  { %551 = vmatmul.mubr.bf16.gmra.mxu0 %v1046_v58 }
  0x54   :  { %648 = vmatmul.mubr.bf16.gmra.mxu1 %v1047_v59  ;;  %558 = vmatprep.mubr.bf16.mxu0 %v1048_v60 }
  0x55   :  { %655 = vmatprep.mubr.bf16.mxu1 %v1050_v61 }
  0x5b   :  { %559 = vmatmul.mubr.bf16.gmra.mxu0 %v1052_v62 }
  0x5c   :  { %656 = vmatmul.mubr.bf16.gmra.mxu1 %v1053_v63 }
  0xe3   :  { %v862_v0 = vpop.f32.mrf.mxu0 }
  0xe4   :  { %v926_v1 = vpop.f32.mrf.mxu1 }
  0xe5   :  { %v863_v3 = vpop.f32.mrf.mxu0 }
  0xe6   :  { %v864_v4 = vadd.f32 %v863_v3, %v862_v0  ;;  %v927_v5 = vpop.f32.mrf.mxu1 }
  0xe7   :  { %v865_v6 = vpop.f32.mrf.mxu0  ;;  %v928_v8 = vadd.f32 %v927_v5, %v926_v1 }
  0xe8   :  { %v505_v7 = vadd.f32 %v864_v4, %v1269_v2  ;;  %v929_v9 = vpop.f32.mrf.mxu1 }
  0xe9   :  { %v866_v10 = vpop.f32.mrf.mxu0 }
  0xea   :  { %v602_v11 = vadd.f32 %v928_v8, %v505_v7  ;;  %v867_v12 = vadd.f32 %v866_v10, %v865_v6  ;;  %v930_v13 = vpop.f32.mrf.mxu1 }
  0xeb   :  { %v868_v14 = vpop.f32.mrf.mxu0  ;;  %v931_v17 = vadd.f32 %v930_v13, %v929_v9 }
  0xec   :  { %v830_v15 = vpack.c.bf16 %v602_v11, %v602_v11  ;;  %v508_v16 = vadd.f32 %v867_v12, %v1269_v2  ;;  %v932_v18 = vpop.f32.mrf.mxu1 }
  0xed   :  { %v869_v19 = vpop.f32.mrf.mxu0 }
  0xee   :  { %729 = vst.msk [vmem:[%s1354_s3] sm:$0xf] %vm728_vm0, %v830_v15  ;;  %v605_v20 = vadd.f32 %v931_v17, %v508_v16  ;;  %v870_v21 = vadd.f32 %v869_v19, %v868_v14  ;;  %v933_v22 = vpop.f32.mrf.mxu1 }
  0xef   :  { %v871_v23 = vpop.f32.mrf.mxu0  ;;  %v934_v26 = vadd.f32 %v933_v22, %v932_v18 }
  0xf0   :  { %v831_v24 = vpack.c.bf16 %v605_v20, %v605_v20  ;;  %v513_v25 = vadd.f32 %v870_v21, %v1269_v2  ;;  %v935_v27 = vpop.f32.mrf.mxu1 }
  0xf1   :  { %v872_v28 = vpop.f32.mrf.mxu0 }
  0xf2   :  { %730 = vst.msk [vmem:[%s1354_s3 + $0x4] sm:$0xf] %vm728_vm0, %v831_v24  ;;  %v610_v29 = vadd.f32 %v934_v26, %v513_v25  ;;  %v873_v30 = vadd.f32 %v872_v28, %v871_v23  ;;  %v936_v31 = vpop.f32.mrf.mxu1 }
  0xf3   :  { %v874_v32 = vpop.f32.mrf.mxu0  ;;  %v937_v35 = vadd.f32 %v936_v31, %v935_v27 }
  0xf4   :  { %v832_v33 = vpack.c.bf16 %v610_v29, %v610_v29  ;;  %v516_v34 = vadd.f32 %v873_v30, %v1269_v2  ;;  %v938_v36 = vpop.f32.mrf.mxu1 }
  0xf5   :  { %v875_v37 = vpop.f32.mrf.mxu0 }
  0xf6   :  { %731 = vst.msk [vmem:[%s1354_s3 + $0x8] sm:$0xf] %vm728_vm0, %v832_v33  ;;  %v613_v38 = vadd.f32 %v937_v35, %v516_v34  ;;  %v876_v39 = vadd.f32 %v875_v37, %v874_v32  ;;  %v939_v40 = vpop.f32.mrf.mxu1 }
  0xf7   :  { %v877_v41 = vpop.f32.mrf.mxu0  ;;  %v940_v44 = vadd.f32 %v939_v40, %v938_v36 }
  0xf8   :  { %v833_v42 = vpack.c.bf16 %v613_v38, %v613_v38  ;;  %v521_v43 = vadd.f32 %v876_v39, %v1269_v2  ;;  %v941_v45 = vpop.f32.mrf.mxu1 }
  0xf9   :  { %v878_v46 = vpop.f32.mrf.mxu0 }
  0xfa   :  { %732 = vst.msk [vmem:[%s1354_s3 + $0xc] sm:$0xf] %vm728_vm0, %v833_v42  ;;  %v618_v47 = vadd.f32 %v940_v44, %v521_v43  ;;  %v879_v48 = vadd.f32 %v878_v46, %v877_v41  ;;  %v942_v49 = vpop.f32.mrf.mxu1 }
  0xfb   :  { %v880_v50 = vpop.f32.mrf.mxu0  ;;  %v943_v53 = vadd.f32 %v942_v49, %v941_v45 }
  0xfc   :  { %v834_v51 = vpack.c.bf16 %v618_v47, %v618_v47  ;;  %v524_v52 = vadd.f32 %v879_v48, %v1269_v2  ;;  %v944_v54 = vpop.f32.mrf.mxu1 }
  0xfd   :  { %v881_v55 = vpop.f32.mrf.mxu0 }
  0xfe   :  { %733 = vst.msk [vmem:[%s1354_s3 + $0x10] sm:$0xf] %vm728_vm0, %v834_v51  ;;  %v621_v56 = vadd.f32 %v943_v53, %v524_v52  ;;  %v882_v57 = vadd.f32 %v881_v55, %v880_v50  ;;  %v945_v58 = vpop.f32.mrf.mxu1 }
  0xff   :  { %v883_v59 = vpop.f32.mrf.mxu0  ;;  %v946_v62 = vadd.f32 %v945_v58, %v944_v54 }
 0x100   :  { %v835_v60 = vpack.c.bf16 %v621_v56, %v621_v56  ;;  %v529_v61 = vadd.f32 %v882_v57, %v1269_v2  ;;  %v947_v63 = vpop.f32.mrf.mxu1 }
 0x101   :  { %v884_v0 = vpop.f32.mrf.mxu0 }
 0x102   :  { %734 = vst.msk [vmem:[%s1354_s3 + $0x14] sm:$0xf] %vm728_vm0, %v835_v60  ;;  %v626_v1 = vadd.f32 %v946_v62, %v529_v61  ;;  %v885_v3 = vadd.f32 %v884_v0, %v883_v59  ;;  %v948_v4 = vpop.f32.mrf.mxu1 }
 0x103   :  { %v886_v5 = vpop.f32.mrf.mxu0  ;;  %v949_v8 = vadd.f32 %v948_v4, %v947_v63 }
 0x104   :  { %v836_v6 = vpack.c.bf16 %v626_v1, %v626_v1  ;;  %v532_v7 = vadd.f32 %v885_v3, %v1269_v2  ;;  %v950_v9 = vpop.f32.mrf.mxu1 }
 0x105   :  { %v887_v10 = vpop.f32.mrf.mxu0 }
 0x106   :  { %735 = vst.msk [vmem:[%s1354_s3 + $0x18] sm:$0xf] %vm728_vm0, %v836_v6  ;;  %v629_v11 = vadd.f32 %v949_v8, %v532_v7  ;;  %v888_v12 = vadd.f32 %v887_v10, %v886_v5  ;;  %v951_v13 = vpop.f32.mrf.mxu1 }
 0x107   :  { %v889_v14 = vpop.f32.mrf.mxu0  ;;  %v952_v17 = vadd.f32 %v951_v13, %v950_v9 }
 0x108   :  { %v837_v15 = vpack.c.bf16 %v629_v11, %v629_v11  ;;  %v537_v16 = vadd.f32 %v888_v12, %v1269_v2  ;;  %v953_v18 = vpop.f32.mrf.mxu1 }
 0x109   :  { %v890_v19 = vpop.f32.mrf.mxu0 }
 0x10a   :  { %736 = vst.msk [vmem:[%s1354_s3 + $0x1c] sm:$0xf] %vm728_vm0, %v837_v15  ;;  %v634_v20 = vadd.f32 %v952_v17, %v537_v16  ;;  %v891_v21 = vadd.f32 %v890_v19, %v889_v14  ;;  %v954_v22 = vpop.f32.mrf.mxu1 }
 0x10b   :  { %v892_v23 = vpop.f32.mrf.mxu0  ;;  %v955_v26 = vadd.f32 %v954_v22, %v953_v18 }
 0x10c   :  { %v838_v24 = vpack.c.bf16 %v634_v20, %v634_v20  ;;  %v540_v25 = vadd.f32 %v891_v21, %v1269_v2  ;;  %v956_v27 = vpop.f32.mrf.mxu1 }
 0x10d   :  { %v893_v28 = vpop.f32.mrf.mxu0 }
 0x10e   :  { %737 = vst.msk [vmem:[%s1354_s3 + $0x20] sm:$0xf] %vm728_vm0, %v838_v24  ;;  %v637_v29 = vadd.f32 %v955_v26, %v540_v25  ;;  %v894_v30 = vadd.f32 %v893_v28, %v892_v23  ;;  %v957_v31 = vpop.f32.mrf.mxu1 }
 0x10f   :  { %v895_v32 = vpop.f32.mrf.mxu0  ;;  %v958_v35 = vadd.f32 %v957_v31, %v956_v27 }
 0x110   :  { %v839_v33 = vpack.c.bf16 %v637_v29, %v637_v29  ;;  %v545_v34 = vadd.f32 %v894_v30, %v1269_v2  ;;  %v959_v36 = vpop.f32.mrf.mxu1 }
 0x111   :  { %v896_v37 = vpop.f32.mrf.mxu0 }
 0x112   :  { %738 = vst.msk [vmem:[%s1354_s3 + $0x24] sm:$0xf] %vm728_vm0, %v839_v33  ;;  %v642_v38 = vadd.f32 %v958_v35, %v545_v34  ;;  %v897_v39 = vadd.f32 %v896_v37, %v895_v32  ;;  %v960_v40 = vpop.f32.mrf.mxu1 }
 0x113   :  { %v898_v41 = vpop.f32.mrf.mxu0  ;;  %v961_v44 = vadd.f32 %v960_v40, %v959_v36 }
 0x114   :  { %v840_v42 = vpack.c.bf16 %v642_v38, %v642_v38  ;;  %v548_v43 = vadd.f32 %v897_v39, %v1269_v2  ;;  %v962_v45 = vpop.f32.mrf.mxu1 }
 0x115   :  { %v899_v46 = vpop.f32.mrf.mxu0 }
 0x116   :  { %739 = vst.msk [vmem:[%s1354_s3 + $0x28] sm:$0xf] %vm728_vm0, %v840_v42  ;;  %v645_v47 = vadd.f32 %v961_v44, %v548_v43  ;;  %v900_v48 = vadd.f32 %v899_v46, %v898_v41  ;;  %v963_v49 = vpop.f32.mrf.mxu1 }
 0x117   :  { %v901_v50 = vpop.f32.mrf.mxu0  ;;  %v964_v53 = vadd.f32 %v963_v49, %v962_v45 }
 0x118   :  { %v841_v51 = vpack.c.bf16 %v645_v47, %v645_v47  ;;  %v553_v52 = vadd.f32 %v900_v48, %v1269_v2  ;;  %v965_v54 = vpop.f32.mrf.mxu1 }
 0x119   :  { %v902_v55 = vpop.f32.mrf.mxu0 }
 0x11a   :  { %740 = vst.msk [vmem:[%s1354_s3 + $0x2c] sm:$0xf] %vm728_vm0, %v841_v51  ;;  %v650_v56 = vadd.f32 %v964_v53, %v553_v52  ;;  %v903_v57 = vadd.f32 %v902_v55, %v901_v50  ;;  %v966_v58 = vpop.f32.mrf.mxu1 }
 0x11b   :  { %v904_v59 = vpop.f32.mrf.mxu0  ;;  %v967_v62 = vadd.f32 %v966_v58, %v965_v54 }
 0x11c   :  { %v842_v60 = vpack.c.bf16 %v650_v56, %v650_v56  ;;  %v556_v61 = vadd.f32 %v903_v57, %v1269_v2  ;;  %v968_v63 = vpop.f32.mrf.mxu1 }
 0x11d   :  { %v905_v0 = vpop.f32.mrf.mxu0 }
 0x11e   :  { %741 = vst.msk [vmem:[%s1354_s3 + $0x30] sm:$0xf] %vm728_vm0, %v842_v60  ;;  %v653_v1 = vadd.f32 %v967_v62, %v556_v61  ;;  %v906_v3 = vadd.f32 %v905_v0, %v904_v59  ;;  %v969_v4 = vpop.f32.mrf.mxu1 }
 0x11f   :  { %v907_v5 = vpop.f32.mrf.mxu0  ;;  %v970_v8 = vadd.f32 %v969_v4, %v968_v63 }
 0x120   :  { %v843_v6 = vpack.c.bf16 %v653_v1, %v653_v1  ;;  %v561_v7 = vadd.f32 %v906_v3, %v1269_v2  ;;  %v971_v9 = vpop.f32.mrf.mxu1 }
 0x121   :  { %v908_v10 = vpop.f32.mrf.mxu0 }
 0x122   :  { %742 = vst.msk [vmem:[%s1354_s3 + $0x34] sm:$0xf] %vm728_vm0, %v843_v6  ;;  %v658_v11 = vadd.f32 %v970_v8, %v561_v7  ;;  %v909_v12 = vadd.f32 %v908_v10, %v907_v5  ;;  %v972_v13 = vpop.f32.mrf.mxu1 }
 0x123   :  { %v973_v16 = vadd.f32 %v972_v13, %v971_v9 }
 0x124   :  { %v844_v14 = vpack.c.bf16 %v658_v11, %v658_v11  ;;  %v564_v15 = vadd.f32 %v909_v12, %v1269_v2 }
 0x126   :  { %743 = vst.msk [vmem:[%s1354_s3 + $0x38] sm:$0xf] %vm728_vm0, %v844_v14  ;;  %v661_v17 = vadd.f32 %v973_v16, %v564_v15 }
 0x128   :  { %v845_v18 = vpack.c.bf16 %v661_v17, %v661_v17 }
 0x12a   :  { %744 = vst.msk [vmem:[%s1354_s3 + $0x3c] sm:$0xf] %vm728_vm0, %v845_v18 }

// kernel: convnet_forward.10
= control target key start
LH: loop header
LB: loop body
LE: loop exit
PB: predicated region body
PF: predicated region fallthrough
CT: control target
= control target key end

     0   :  { %v279_v6 = vmov 1966171168   ;;  %v67_v8 = vlaneseq  ;;  %vm216_vm0 = vcmask 123904   ;;  %s357_s1 = inlined_call_operand.vmem [shape: bf16[256,16], index: 1, kind: input, shape index: {}]   ;;  %s358_s0 = inlined_call_operand.vmem [shape: bf16[2,256], index: 0, kind: input, shape index: {}]   ;;  %s359_s2 = inlined_call_operand.vmem [shape: f32[1,16], index: 2, kind: input, shape index: {}]   ;;  %s360_s3 = inlined_call_operand.vmem [shape: f32[2,16], index: 3, kind: output, shape index: {}]  }
   0x1   :  { %v263_v0 = vld [vmem:[%s357_s1 + $0x78] sm:$0xff]   ;;  %v265_v2 = vld [vmem:[%s357_s1 + $0x70] sm:$0xff]   ;;  %v267_v4 = vld [vmem:[%s357_s1 + $0x68] sm:$0xff]   ;;  %v65_v7 = vunpack.c.l.s4 %v279_v6 }
   0x2   :  { %v264_v1 = vld [vmem:[%s357_s1 + $0x38] sm:$0xff]   ;;  %240 = vmatprep.subr.bf16.mxu0 %v263_v0  ;;  %v266_v3 = vld [vmem:[%s357_s1 + $0x30] sm:$0xff]   ;;  %v268_v5 = vld [vmem:[%s357_s1 + $0x28] sm:$0xff]   ;;  %v68_v12 = vshrl.u32 %v67_v8, 7 }
   0x3   :  { %241 = vmatpush3.bf16.msra.mxu0 %v264_v1  ;;  %v269_v9 = vld [vmem:[%s357_s1 + $0x60] sm:$0xff]   ;;  %v66_v11 = vunpack.c.0.s8 %v65_v7  ;;  %v271_v13 = vld [vmem:[%s357_s1 + $0x58] sm:$0xff]   ;;  %v273_v16 = vld [vmem:[%s357_s1 + $0x50] sm:$0xff]  }
   0x4   :  { %242 = vmatprep.subr.bf16.mxu0 %v265_v2  ;;  %v270_v10 = vld [vmem:[%s357_s1 + $0x20] sm:$0xff]   ;;  %v272_v14 = vld [vmem:[%s357_s1 + $0x18] sm:$0xff]   ;;  %v274_v19 = vld [vmem:[%s357_s1 + $0x10] sm:$0xff]  }
   0x5   :  { %v69_v15 = vsub.s32 %v66_v11, %v68_v12  ;;  %v223_v17 = vld.sshfl [vmem:[%s358_s0] sm:$0x11 pattern:$0x75316420]  ;;  %v275_v21 = vld [vmem:[%s357_s1 + $0x48] sm:$0xff]  }
   0x6   :  { %v63_v18 = vcombine.high %v223_v17, %v223_v17  ;;  %v276_v22 = vld [vmem:[%s357_s1 + $0x8] sm:$0xff]   ;;  %v277_v23 = vld [vmem:[%s357_s1 + $0x40] sm:$0xff]  }
   0x7   :  { %243 = vmatpush3.bf16.msra.mxu0 %v266_v3  ;;  %v278_v24 = vld [vmem:[%s357_s1] sm:$0xff]   ;;  %v70_v25 = vrot.slane %v223_v17, %v69_v15 }
   0x8   :  { %244 = vmatprep.subr.bf16.mxu0 %v267_v4  ;;  %v77_v20 = vrot.slane %v63_v18, %v69_v15  ;;  %v222_v27 = vld [vmem:[%s359_s2] ss:$0 sm:$0xff] }
   0xa   :  { %208 = vmatprep.mubr.bf16.mxu0 %v77_v20 }
   0xb   :  { %245 = vmatpush3.bf16.msra.mxu0 %v268_v5 }
   0xc   :  { %246 = vmatprep.subr.bf16.mxu0 %v269_v9 }
   0xf   :  { %247 = vmatpush3.bf16.msra.mxu0 %v270_v10 }
  0x10   :  { %248 = vmatprep.subr.bf16.mxu0 %v271_v13 }
  0x13   :  { %249 = vmatpush3.bf16.msra.mxu0 %v272_v14 }
  0x14   :  { %250 = vmatprep.subr.bf16.mxu0 %v273_v16 }
  0x17   :  { %251 = vmatpush3.bf16.msra.mxu0 %v274_v19 }
  0x18   :  { %252 = vmatprep.subr.bf16.mxu0 %v275_v21 }
  0x1b   :  { %253 = vmatpush3.bf16.msra.mxu0 %v276_v22 }
  0x1c   :  { %254 = vmatprep.subr.bf16.mxu0 %v277_v23 }
  0x1f   :  { %255 = vmatpush3.bf16.msra.mxu0 %v278_v24 }
  0x22   :  { %209 = vmatmul.mubr.bf16.vlgmr.msra.gmra.mxu0 %v70_v25 }
  0xe2   :  { %v256_v26 = vpop.f32.mrf.mxu0 }
  0xe4   :  { %v257_v28 = vpop.f32.mrf.mxu0 }
  0xe5   :  { %v258_v29 = vadd.f32 %v257_v28, %v256_v26 }
  0xe6   :  { %v259_v30 = vpop.f32.mrf.mxu0 }
  0xe7   :  { %v211_v31 = vadd.f32 %v258_v29, %v222_v27 }
  0xe8   :  { %v260_v32 = vpop.f32.mrf.mxu0 }
  0xe9   :  { %217 = vst.msk [vmem:[%s360_s3] sm:$0x3] %vm216_vm0, %v211_v31 }

// kernel: convnet_forward.9
= control target key start
LH: loop header
LB: loop body
LE: loop exit
PB: predicated region body
PF: predicated region fallthrough
CT: control target
= control target key end

     0   :  { %v145_v36 = vlaneseq  ;;  %v1366_v37 = vmov 1966171168   ;;  %s1799_s1 = inlined_call_operand.vmem [shape: bf16[1024,256], index: 1, kind: input, shape index: {}]   ;;  %s1800_s0 = inlined_call_operand.vmem [shape: bf16[2,1024], index: 0, kind: input, shape index: {}]   ;;  %s1801_s2 = inlined_call_operand.vmem [shape: f32[1,256], index: 2, kind: input, shape index: {}]   ;;  %s1802_s3 = inlined_call_operand.vmem [shape: bf16[2,256], index: 3, kind: output, shape index: {}]  }
   0x1   :  { %v1173_v0 = vld [vmem:[%s1799_s1 + $0x74] ss:$8 sps:$4 sm:$0xff]   ;;  %v1177_v2 = vld [vmem:[%s1799_s1 + $0x70] ss:$8 sps:$4 sm:$0xff]   ;;  %v1179_v4 = vld [vmem:[%s1799_s1 + $0x64] ss:$8 sps:$4 sm:$0xff]   ;;  %v158_v38 = vunpack.c.l.s4 %v1366_v37 }
   0x2   :  { %v1175_v1 = vld [vmem:[%s1799_s1 + $0x174] ss:$8 sps:$4 sm:$0xff]   ;;  %853 = vmatprep.subr.bf16.mxu0 %v1173_v0  ;;  %v1178_v3 = vld [vmem:[%s1799_s1 + $0x170] ss:$8 sps:$4 sm:$0xff]   ;;  %v1181_v5 = vld [vmem:[%s1799_s1 + $0x164] ss:$8 sps:$4 sm:$0xff]  }
   0x3   :  { %894 = vmatprep.subr.bf16.mxu1 %v1175_v1  ;;  %854 = vmatpush1.bf16.msra.mxu0 %v1177_v2  ;;  %v1183_v6 = vld [vmem:[%s1799_s1 + $0x60] ss:$8 sps:$4 sm:$0xff]   ;;  %v1185_v8 = vld [vmem:[%s1799_s1 + $0x54] ss:$8 sps:$4 sm:$0xff]   ;;  %v1189_v10 = vld [vmem:[%s1799_s1 + $0x50] ss:$8 sps:$4 sm:$0xff]   ;;  %v159_v43 = vunpack.c.0.s8 %v158_v38 }
   0x4   :  { %895 = vmatpush1.bf16.msra.mxu1 %v1178_v3  ;;  %855 = vmatprep.subr.bf16.mxu0 %v1179_v4  ;;  %v1184_v7 = vld [vmem:[%s1799_s1 + $0x160] ss:$8 sps:$4 sm:$0xff]   ;;  %v1187_v9 = vld [vmem:[%s1799_s1 + $0x154] ss:$8 sps:$4 sm:$0xff]   ;;  %v1190_v11 = vld [vmem:[%s1799_s1 + $0x150] ss:$8 sps:$4 sm:$0xff]  }
   0x5   :  { %896 = vmatprep.subr.bf16.mxu1 %v1181_v5  ;;  %v1191_v12 = vld [vmem:[%s1799_s1 + $0x44] ss:$8 sps:$4 sm:$0xff]   ;;  %v1195_v14 = vld [vmem:[%s1799_s1 + $0x40] ss:$8 sps:$4 sm:$0xff]   ;;  %v1197_v16 = vld [vmem:[%s1799_s1 + $0x34] ss:$8 sps:$4 sm:$0xff]  }
   0x6   :  { %v1193_v13 = vld [vmem:[%s1799_s1 + $0x144] ss:$8 sps:$4 sm:$0xff]   ;;  %v1196_v15 = vld [vmem:[%s1799_s1 + $0x140] ss:$8 sps:$4 sm:$0xff]   ;;  %v1199_v17 = vld [vmem:[%s1799_s1 + $0x134] ss:$8 sps:$4 sm:$0xff]  }
   0x7   :  { %856 = vmatpush1.bf16.msra.mxu0 %v1183_v6  ;;  %v1201_v18 = vld [vmem:[%s1799_s1 + $0x30] ss:$8 sps:$4 sm:$0xff]   ;;  %v1203_v20 = vld [vmem:[%s1799_s1 + $0x24] ss:$8 sps:$4 sm:$0xff]   ;;  %v1207_v22 = vld [vmem:[%s1799_s1 + $0x20] ss:$8 sps:$4 sm:$0xff]  }
   0x8   :  { %897 = vmatpush1.bf16.msra.mxu1 %v1184_v7  ;;  %857 = vmatprep.subr.bf16.mxu0 %v1185_v8  ;;  %v1202_v19 = vld [vmem:[%s1799_s1 + $0x130] ss:$8 sps:$4 sm:$0xff]   ;;  %v1205_v21 = vld [vmem:[%s1799_s1 + $0x124] ss:$8 sps:$4 sm:$0xff]   ;;  %v1208_v23 = vld [vmem:[%s1799_s1 + $0x120] ss:$8 sps:$4 sm:$0xff]  }
   0x9   :  { %898 = vmatprep.subr.bf16.mxu1 %v1187_v9  ;;  %v1209_v24 = vld [vmem:[%s1799_s1 + $0x14] ss:$8 sps:$4 sm:$0xff]   ;;  %v1213_v26 = vld [vmem:[%s1799_s1 + $0x10] ss:$8 sps:$4 sm:$0xff]   ;;  %v1215_v28 = vld [vmem:[%s1799_s1 + $0x4] ss:$8 sps:$4 sm:$0xff]  }
   0xa   :  { %v1211_v25 = vld [vmem:[%s1799_s1 + $0x114] ss:$8 sps:$4 sm:$0xff]   ;;  %v1214_v27 = vld [vmem:[%s1799_s1 + $0x110] ss:$8 sps:$4 sm:$0xff]   ;;  %v1217_v29 = vld [vmem:[%s1799_s1 + $0x104] ss:$8 sps:$4 sm:$0xff]  }
   0xb   :  { %858 = vmatpush1.bf16.msra.mxu0 %v1189_v10  ;;  %v1219_v30 = vld [vmem:[%s1799_s1] ss:$8 sps:$4 sm:$0xff]   ;;  %v1221_v32 = vld [vmem:[%s1799_s1 + $0xf4] ss:$8 sps:$4 sm:$0xff]   ;;  %v1225_v34 = vld [vmem:[%s1799_s1 + $0xf0] ss:$8 sps:$4 sm:$0xff]  }
   0xc   :  { %899 = vmatpush1.bf16.msra.mxu1 %v1190_v11  ;;  %859 = vmatprep.subr.bf16.mxu0 %v1191_v12  ;;  %v1220_v31 = vld [vmem:[%s1799_s1 + $0x100] ss:$8 sps:$4 sm:$0xff]   ;;  %v1223_v33 = vld [vmem:[%s1799_s1 + $0x1f4] ss:$8 sps:$4 sm:$0xff]   ;;  %v1226_v35 = vld [vmem:[%s1799_s1 + $0x1f0] ss:$8 sps:$4 sm:$0xff]  }
   0xd   :  { %900 = vmatprep.subr.bf16.mxu1 %v1193_v13  ;;  %v1227_v39 = vld [vmem:[%s1799_s1 + $0xe4] ss:$8 sps:$4 sm:$0xff]   ;;  %v1231_v41 = vld [vmem:[%s1799_s1 + $0xe0] ss:$8 sps:$4 sm:$0xff]   ;;  %v1504_v42 = vshrl.u32 %v145_v36, 7 }
   0xe   :  { %v1229_v40 = vld [vmem:[%s1799_s1 + $0x1e4] ss:$8 sps:$4 sm:$0xff]   ;;  %v1232_v44 = vld [vmem:[%s1799_s1 + $0x1e0] ss:$8 sps:$4 sm:$0xff]   ;;  %v1233_v45 = vld [vmem:[%s1799_s1 + $0xd4] ss:$8 sps:$4 sm:$0xff]  }
   0xf   :  { %860 = vmatpush1.bf16.msra.mxu0 %v1195_v14  ;;  %v1235_v46 = vld [vmem:[%s1799_s1 + $0x1d4] ss:$8 sps:$4 sm:$0xff]   ;;  %v1237_v47 = vld [vmem:[%s1799_s1 + $0xd0] ss:$8 sps:$4 sm:$0xff]   ;;  %v1522_v49 = vsub.s32 %v159_v43, %v1504_v42  ;;  %v1239_v50 = vld [vmem:[%s1799_s1 + $0xc4] ss:$8 sps:$4 sm:$0xff]  }
  0x10   :  { %901 = vmatpush1.bf16.msra.mxu1 %v1196_v15  ;;  %861 = vmatprep.subr.bf16.mxu0 %v1197_v16  ;;  %v1238_v48 = vld [vmem:[%s1799_s1 + $0x1d0] ss:$8 sps:$4 sm:$0xff]   ;;  %v1241_v51 = vld [vmem:[%s1799_s1 + $0x1c4] ss:$8 sps:$4 sm:$0xff]   ;;  %v1243_v53 = vld [vmem:[%s1799_s1 + $0xc0] ss:$8 sps:$4 sm:$0xff]  }
  0x11   :  { %902 = vmatprep.subr.bf16.mxu1 %v1199_v17  ;;  %v14_v52 = vld [vmem:[%s1800_s0] sm:$0xff]  ;;  %v1245_v56 = vld [vmem:[%s1799_s1 + $0xb4] ss:$8 sps:$4 sm:$0xff]   ;;  %v1249_v59 = vld [vmem:[%s1799_s1 + $0xb0] ss:$8 sps:$4 sm:$0xff]  }
  0x12   :  { %v163_v54 = vrot.slane %v14_v52, %v1522_v49  ;;  %v1244_v55 = vld [vmem:[%s1799_s1 + $0x1c0] ss:$8 sps:$4 sm:$0xff]   ;;  %v1247_v57 = vld [vmem:[%s1799_s1 + $0x1b4] ss:$8 sps:$4 sm:$0xff]   ;;  %v1250_v61 = vld [vmem:[%s1799_s1 + $0x1b0] ss:$8 sps:$4 sm:$0xff]   ;;  %v156_v1 = vcombine.high %v14_v52, %v14_v52 }
  0x13   :  { %862 = vmatpush1.bf16.msra.mxu0 %v1201_v18  ;;  %v1251_v62 = vld [vmem:[%s1799_s1 + $0xa4] ss:$8 sps:$4 sm:$0xff]   ;;  %v1255_v2 = vld [vmem:[%s1799_s1 + $0xa0] ss:$8 sps:$4 sm:$0xff]   ;;  %v1257_v4 = vld [vmem:[%s1799_s1 + $0x94] ss:$8 sps:$4 sm:$0xff]  }
  0x14   :  { %903 = vmatpush1.bf16.msra.mxu1 %v1202_v19  ;;  %863 = vmatprep.subr.bf16.mxu0 %v1203_v20  ;;  %v171_v58 = vcombine.high %v163_v54, %v163_v54  ;;  %v1253_v63 = vld [vmem:[%s1799_s1 + $0x1a4] ss:$8 sps:$4 sm:$0xff]   ;;  %v1256_v3 = vld [vmem:[%s1799_s1 + $0x1a0] ss:$8 sps:$4 sm:$0xff]   ;;  %v1259_v5 = vld [vmem:[%s1799_s1 + $0x194] ss:$8 sps:$4 sm:$0xff]   ;;  %v1572_v6 = vrot.slane %v156_v1, %v1522_v49  ;;  %v179_v13 = vrot.slane %v163_v54, %v1522_v49 }
  0x15   :  { %904 = vmatprep.subr.bf16.mxu1 %v1205_v21  ;;  %v1261_v7 = vld [vmem:[%s1799_s1 + $0x90] ss:$8 sps:$4 sm:$0xff]   ;;  %v1263_v9 = vld [vmem:[%s1799_s1 + $0x84] ss:$8 sps:$4 sm:$0xff]   ;;  %v1267_v12 = vld [vmem:[%s1799_s1 + $0x80] ss:$8 sps:$4 sm:$0xff]  }
  0x16   :  { %v193_v60 = vrot.slane %v171_v58, %v1522_v49  ;;  %v1262_v8 = vld [vmem:[%s1799_s1 + $0x190] ss:$8 sps:$4 sm:$0xff]   ;;  %v1265_v10 = vld [vmem:[%s1799_s1 + $0x184] ss:$8 sps:$4 sm:$0xff]   ;;  %v172_v11 = vcombine.high %v1572_v6, %v1572_v6  ;;  %v1268_v14 = vld [vmem:[%s1799_s1 + $0x180] ss:$8 sps:$4 sm:$0xff]   ;;  %v201_v18 = vcombine.high %v179_v13, %v179_v13 }
  0x17   :  { %864 = vmatpush1.bf16.msra.mxu0 %v1207_v22  ;;  %v1272_v15 = vld [vmem:[%s1799_s1 + $0x274] ss:$8 sps:$4 sm:$0xff]   ;;  %v1270_v19 = vld [vmem:[%s1799_s1 + $0x270] ss:$8 sps:$4 sm:$0xff]   ;;  %v1278_v21 = vld [vmem:[%s1799_s1 + $0x264] ss:$8 sps:$4 sm:$0xff]  }
  0x18   :  { %905 = vmatpush1.bf16.msra.mxu1 %v1208_v23  ;;  %865 = vmatprep.subr.bf16.mxu0 %v1209_v24  ;;  %v203_v0 = vcombine.high %v193_v60, %v193_v60  ;;  %v1275_v16 = vld [vmem:[%s1799_s1 + $0x374] ss:$8 sps:$4 sm:$0xff]   ;;  %v200_v17 = vrot.slane %v172_v11, %v1522_v49  ;;  %v1273_v20 = vld [vmem:[%s1799_s1 + $0x370] ss:$8 sps:$4 sm:$0xff]   ;;  %v1281_v22 = vld [vmem:[%s1799_s1 + $0x364] ss:$8 sps:$4 sm:$0xff]  }
  0x19   :  { %906 = vmatprep.subr.bf16.mxu1 %v1211_v25  ;;  %885 = vmatprep.mubr.bf16.mxu0 %v193_v60  ;;  %v1276_v24 = vld [vmem:[%s1799_s1 + $0x260] ss:$8 sps:$4 sm:$0xff]   ;;  %v1294_v36 = vld [vmem:[%s1799_s1 + $0x230] ss:$8 sps:$4 sm:$0xff]   ;;  %v1302_v38 = vld [vmem:[%s1799_s1 + $0x224] ss:$8 sps:$4 sm:$0xff]  }
  0x1a   :  { %926 = vmatprep.mubr.bf16.mxu1 %v203_v0  ;;  %v204_v23 = vcombine.high %v200_v17, %v200_v17  ;;  %v1279_v25 = vld [vmem:[%s1799_s1 + $0x360] ss:$8 sps:$4 sm:$0xff]   ;;  %v1297_v37 = vld [vmem:[%s1799_s1 + $0x330] ss:$8 sps:$4 sm:$0xff]   ;;  %v1308_v43 = vld [vmem:[%s1799_s1 + $0x214] ss:$8 sps:$4 sm:$0xff]  }
  0x1b   :  { %866 = vmatpush1.bf16.msra.mxu0 %v1213_v26  ;;  %v1284_v26 = vld [vmem:[%s1799_s1 + $0x254] ss:$8 sps:$4 sm:$0xff]   ;;  %v1318_v54 = vld [vmem:[%s1799_s1 + $0x2f0] ss:$8 sps:$4 sm:$0xff]   ;;  %v1324_v58 = vld [vmem:[%s1799_s1 + $0x2e0] ss:$8 sps:$4 sm:$0xff]  }
  0x1c   :  { %907 = vmatpush1.bf16.msra.mxu1 %v1214_v27  ;;  %867 = vmatprep.subr.bf16.mxu0 %v1215_v28  ;;  %v1287_v27 = vld [vmem:[%s1799_s1 + $0x354] ss:$8 sps:$4 sm:$0xff]   ;;  %v1282_v28 = vld [vmem:[%s1799_s1 + $0x250] ss:$8 sps:$4 sm:$0xff]   ;;  %v1338_v0 = vld [vmem:[%s1799_s1 + $0x2c4] ss:$8 sps:$4 sm:$0xff]  }
  0x1d   :  { %908 = vmatprep.subr.bf16.mxu1 %v1217_v29  ;;  %v1285_v29 = vld [vmem:[%s1799_s1 + $0x350] ss:$8 sps:$4 sm:$0xff]   ;;  %v1320_v52 = vld [vmem:[%s1799_s1 + $0x2f4] ss:$8 sps:$4 sm:$0xff]   ;;  %v1341_v1 = vld [vmem:[%s1799_s1 + $0x3c4] ss:$8 sps:$4 sm:$0xff]  }
  0x1e   :  { %v1332_v60 = vld [vmem:[%s1799_s1 + $0x2d4] ss:$8 sps:$4 sm:$0xff]   ;;  %v1348_v11 = vld [vmem:[%s1799_s1 + $0x2a0] ss:$8 sps:$4 sm:$0xff]  }
  0x1f   :  { %868 = vmatpush1.bf16.msra.mxu0 %v1219_v30  ;;  %v1290_v30 = vld [vmem:[%s1799_s1 + $0x244] ss:$8 sps:$4 sm:$0xff]  }
  0x20   :  { %909 = vmatpush1.bf16.msra.mxu1 %v1220_v31  ;;  %869 = vmatprep.subr.bf16.mxu0 %v1221_v32  ;;  %v1293_v31 = vld [vmem:[%s1799_s1 + $0x344] ss:$8 sps:$4 sm:$0xff]   ;;  %v1288_v32 = vld [vmem:[%s1799_s1 + $0x240] ss:$8 sps:$4 sm:$0xff]  }
  0x21   :  { %910 = vmatprep.subr.bf16.mxu1 %v1223_v33  ;;  %v1291_v33 = vld [vmem:[%s1799_s1 + $0x340] ss:$8 sps:$4 sm:$0xff]  }
  0x23   :  { %870 = vmatpush2.bf16.msra.mxu0 %v1225_v34  ;;  %v1296_v34 = vld [vmem:[%s1799_s1 + $0x234] ss:$8 sps:$4 sm:$0xff]  }
  0x24   :  { %911 = vmatpush2.bf16.msra.mxu1 %v1226_v35  ;;  %871 = vmatprep.subr.bf16.mxu0 %v1227_v39  ;;  %v1299_v35 = vld [vmem:[%s1799_s1 + $0x334] ss:$8 sps:$4 sm:$0xff]   ;;  %v1305_v39 = vld [vmem:[%s1799_s1 + $0x324] ss:$8 sps:$4 sm:$0xff]  }
  0x25   :  { %912 = vmatprep.subr.bf16.mxu1 %v1229_v40  ;;  %v1300_v40 = vld [vmem:[%s1799_s1 + $0x220] ss:$8 sps:$4 sm:$0xff]  }
  0x27   :  { %872 = vmatpush2.bf16.msra.mxu0 %v1231_v41  ;;  %v1303_v41 = vld [vmem:[%s1799_s1 + $0x320] ss:$8 sps:$4 sm:$0xff]  }
  0x28   :  { %913 = vmatpush2.bf16.msra.mxu1 %v1232_v44  ;;  %873 = vmatprep.subr.bf16.mxu0 %v1233_v45  ;;  %v1311_v44 = vld [vmem:[%s1799_s1 + $0x314] ss:$8 sps:$4 sm:$0xff]   ;;  %v1306_v45 = vld [vmem:[%s1799_s1 + $0x210] ss:$8 sps:$4 sm:$0xff]  }
  0x29   :  { %914 = vmatprep.subr.bf16.mxu1 %v1235_v46  ;;  %v1309_v46 = vld [vmem:[%s1799_s1 + $0x310] ss:$8 sps:$4 sm:$0xff]  }
  0x2b   :  { %874 = vmatpush2.bf16.msra.mxu0 %v1237_v47  ;;  %v1314_v47 = vld [vmem:[%s1799_s1 + $0x204] ss:$8 sps:$4 sm:$0xff]  }
  0x2c   :  { %915 = vmatpush2.bf16.msra.mxu1 %v1238_v48  ;;  %875 = vmatprep.subr.bf16.mxu0 %v1239_v50  ;;  %v1317_v48 = vld [vmem:[%s1799_s1 + $0x304] ss:$8 sps:$4 sm:$0xff]   ;;  %v1312_v50 = vld [vmem:[%s1799_s1 + $0x200] ss:$8 sps:$4 sm:$0xff]  }
  0x2d   :  { %916 = vmatprep.subr.bf16.mxu1 %v1241_v51  ;;  %v1315_v51 = vld [vmem:[%s1799_s1 + $0x300] ss:$8 sps:$4 sm:$0xff]  }
  0x2f   :  { %876 = vmatpush2.bf16.msra.mxu0 %v1243_v53  ;;  %v1323_v53 = vld [vmem:[%s1799_s1 + $0x3f4] ss:$8 sps:$4 sm:$0xff]  }
  0x30   :  { %917 = vmatpush2.bf16.msra.mxu1 %v1244_v55  ;;  %877 = vmatprep.subr.bf16.mxu0 %v1245_v56  ;;  %v1321_v55 = vld [vmem:[%s1799_s1 + $0x3f0] ss:$8 sps:$4 sm:$0xff]   ;;  %v1326_v56 = vld [vmem:[%s1799_s1 + $0x2e4] ss:$8 sps:$4 sm:$0xff]  }
  0x31   :  { %918 = vmatprep.subr.bf16.mxu1 %v1247_v57  ;;  %v1329_v57 = vld [vmem:[%s1799_s1 + $0x3e4] ss:$8 sps:$4 sm:$0xff]  }
  0x33   :  { %878 = vmatpush2.bf16.msra.mxu0 %v1249_v59  ;;  %v1327_v59 = vld [vmem:[%s1799_s1 + $0x3e0] ss:$8 sps:$4 sm:$0xff]  }
  0x34   :  { %919 = vmatpush2.bf16.msra.mxu1 %v1250_v61  ;;  %879 = vmatprep.subr.bf16.mxu0 %v1251_v62  ;;  %v1335_v61 = vld [vmem:[%s1799_s1 + $0x3d4] ss:$8 sps:$4 sm:$0xff]   ;;  %v1330_v62 = vld [vmem:[%s1799_s1 + $0x2d0] ss:$8 sps:$4 sm:$0xff]  }
  0x35   :  { %920 = vmatprep.subr.bf16.mxu1 %v1253_v63  ;;  %v1333_v63 = vld [vmem:[%s1799_s1 + $0x3d0] ss:$8 sps:$4 sm:$0xff]  }
  0x37   :  { %880 = vmatpush2.bf16.msra.mxu0 %v1255_v2  ;;  %v1336_v2 = vld [vmem:[%s1799_s1 + $0x2c0] ss:$8 sps:$4 sm:$0xff]  }
  0x38   :  { %921 = vmatpush2.bf16.msra.mxu1 %v1256_v3  ;;  %881 = vmatprep.subr.bf16.mxu0 %v1257_v4  ;;  %v1339_v3 = vld [vmem:[%s1799_s1 + $0x3c0] ss:$8 sps:$4 sm:$0xff]   ;;  %v1344_v4 = vld [vmem:[%s1799_s1 + $0x2b4] ss:$8 sps:$4 sm:$0xff]  }
  0x39   :  { %922 = vmatprep.subr.bf16.mxu1 %v1259_v5  ;;  %v1347_v5 = vld [vmem:[%s1799_s1 + $0x3b4] ss:$8 sps:$4 sm:$0xff]  }
  0x3b   :  { %882 = vmatpush2.bf16.msra.mxu0 %v1261_v7  ;;  %v1342_v7 = vld [vmem:[%s1799_s1 + $0x2b0] ss:$8 sps:$4 sm:$0xff]  }
  0x3c   :  { %923 = vmatpush2.bf16.msra.mxu1 %v1262_v8  ;;  %883 = vmatprep.subr.bf16.mxu0 %v1263_v9  ;;  %v1345_v8 = vld [vmem:[%s1799_s1 + $0x3b0] ss:$8 sps:$4 sm:$0xff]   ;;  %v1350_v9 = vld [vmem:[%s1799_s1 + $0x2a4] ss:$8 sps:$4 sm:$0xff]  }
  0x3d   :  { %924 = vmatprep.subr.bf16.mxu1 %v1265_v10  ;;  %v1353_v10 = vld [vmem:[%s1799_s1 + $0x3a4] ss:$8 sps:$4 sm:$0xff]  }
  0x3f   :  { %884 = vmatpush2.bf16.msra.mxu0 %v1267_v12  ;;  %v1351_v12 = vld [vmem:[%s1799_s1 + $0x3a0] ss:$8 sps:$4 sm:$0xff]  }
  0x40   :  { %925 = vmatpush2.bf16.msra.mxu1 %v1268_v14  ;;  %935 = vmatprep.subr.bf16.mxu0 %v1272_v15  ;;  %v1359_v14 = vld [vmem:[%s1799_s1 + $0x394] ss:$8 sps:$4 sm:$0xff]   ;;  %v1354_v15 = vld [vmem:[%s1799_s1 + $0x290] ss:$8 sps:$4 sm:$0xff]  }
  0x41   :  { %976 = vmatprep.subr.bf16.mxu1 %v1275_v16  ;;  %v1357_v16 = vld [vmem:[%s1799_s1 + $0x390] ss:$8 sps:$4 sm:$0xff]  }
  0x42   :  { %886 = vmatmul.mubr.bf16.vlgmr.msra.gmra.mxu0 %v179_v13  ;;  %v1356_v13 = vld [vmem:[%s1799_s1 + $0x294] ss:$8 sps:$4 sm:$0xff]  }
  0x43   :  { %927 = vmatmul.mubr.bf16.vlgmr.msra.gmra.mxu1 %v201_v18  ;;  %936 = vmatpush1.bf16.msra.mxu0 %v1270_v19  ;;  %v1365_v18 = vld [vmem:[%s1799_s1 + $0x384] ss:$8 sps:$4 sm:$0xff]   ;;  %v186_v19 = vrot.slane %v1572_v6, %v1522_v49 }
  0x44   :  { %977 = vmatpush1.bf16.msra.mxu1 %v1273_v20  ;;  %937 = vmatprep.subr.bf16.mxu0 %v1278_v21  ;;  %v1360_v20 = vld [vmem:[%s1799_s1 + $0x280] ss:$8 sps:$4 sm:$0xff]  }
  0x45   :  { %978 = vmatprep.subr.bf16.mxu1 %v1281_v22  ;;  %967 = vmatprep.mubr.bf16.mxu0 %v200_v17  ;;  %v1362_v17 = vld [vmem:[%s1799_s1 + $0x284] ss:$8 sps:$4 sm:$0xff]   ;;  %v1363_v21 = vld [vmem:[%s1799_s1 + $0x380] ss:$8 sps:$4 sm:$0xff]   ;;  %v202_v22 = vcombine.high %v186_v19, %v186_v19 }
  0x46   :  { %1008 = vmatprep.mubr.bf16.mxu1 %v204_v23 }
  0x47   :  { %938 = vmatpush1.bf16.msra.mxu0 %v1276_v24 }
  0x48   :  { %979 = vmatpush1.bf16.msra.mxu1 %v1279_v25  ;;  %939 = vmatprep.subr.bf16.mxu0 %v1284_v26 }
  0x49   :  { %980 = vmatprep.subr.bf16.mxu1 %v1287_v27 }
  0x4b   :  { %940 = vmatpush1.bf16.msra.mxu0 %v1282_v28 }
  0x4c   :  { %981 = vmatpush1.bf16.msra.mxu1 %v1285_v29  ;;  %941 = vmatprep.subr.bf16.mxu0 %v1290_v30  ;;  %v147_v30 = vsub.s32 0, %v1504_v42 }
  0x4d   :  { %982 = vmatprep.subr.bf16.mxu1 %v1293_v31  ;;  %v143_v31 = vld [vmem:[%s1801_s2] sm:$0x3] }
  0x4f   :  { %942 = vmatpush1.bf16.msra.mxu0 %v1288_v32  ;;  %v151_v32 = vsub.s32 1, %v1504_v42 }
  0x50   :  { %983 = vmatpush1.bf16.msra.mxu1 %v1291_v33  ;;  %943 = vmatprep.subr.bf16.mxu0 %v1296_v34  ;;  %v148_v33 = vrot.slane %v143_v31, %v147_v30 }
  0x51   :  { %984 = vmatprep.subr.bf16.mxu1 %v1299_v35  ;;  %v152_v34 = vrot.slane %v143_v31, %v151_v32 }
  0x53   :  { %944 = vmatpush1.bf16.msra.mxu0 %v1294_v36 }
  0x54   :  { %985 = vmatpush1.bf16.msra.mxu1 %v1297_v37  ;;  %945 = vmatprep.subr.bf16.mxu0 %v1302_v38 }
  0x55   :  { %986 = vmatprep.subr.bf16.mxu1 %v1305_v39 }
  0x57   :  { %946 = vmatpush1.bf16.msra.mxu0 %v1300_v40 }
  0x58   :  { %987 = vmatpush1.bf16.msra.mxu1 %v1303_v41  ;;  %947 = vmatprep.subr.bf16.mxu0 %v1308_v43 }
  0x59   :  { %988 = vmatprep.subr.bf16.mxu1 %v1311_v44 }
  0x5b   :  { %948 = vmatpush1.bf16.msra.mxu0 %v1306_v45 }
  0x5c   :  { %989 = vmatpush1.bf16.msra.mxu1 %v1309_v46  ;;  %949 = vmatprep.subr.bf16.mxu0 %v1314_v47 }
  0x5d   :  { %990 = vmatprep.subr.bf16.mxu1 %v1317_v48 }
  0x5f   :  { %950 = vmatpush1.bf16.msra.mxu0 %v1312_v50 }
  0x60   :  { %991 = vmatpush1.bf16.msra.mxu1 %v1315_v51  ;;  %951 = vmatprep.subr.bf16.mxu0 %v1320_v52 }
  0x61   :  { %992 = vmatprep.subr.bf16.mxu1 %v1323_v53 }
  0x63   :  { %952 = vmatpush2.bf16.msra.mxu0 %v1318_v54 }
  0x64   :  { %993 = vmatpush2.bf16.msra.mxu1 %v1321_v55  ;;  %953 = vmatprep.subr.bf16.mxu0 %v1326_v56 }
  0x65   :  { %994 = vmatprep.subr.bf16.mxu1 %v1329_v57 }
  0x67   :  { %954 = vmatpush2.bf16.msra.mxu0 %v1324_v58 }
  0x68   :  { %995 = vmatpush2.bf16.msra.mxu1 %v1327_v59  ;;  %955 = vmatprep.subr.bf16.mxu0 %v1332_v60 }
  0x69   :  { %996 = vmatprep.subr.bf16.mxu1 %v1335_v61 }
  0x6b   :  { %956 = vmatpush2.bf16.msra.mxu0 %v1330_v62 }
  0x6c   :  { %997 = vmatpush2.bf16.msra.mxu1 %v1333_v63  ;;  %957 = vmatprep.subr.bf16.mxu0 %v1338_v0 }
  0x6d   :  { %998 = vmatprep.subr.bf16.mxu1 %v1341_v1 }
  0x6f   :  { %958 = vmatpush2.bf16.msra.mxu0 %v1336_v2 }
  0x70   :  { %999 = vmatpush2.bf16.msra.mxu1 %v1339_v3  ;;  %959 = vmatprep.subr.bf16.mxu0 %v1344_v4 }
  0x71   :  { %1000 = vmatprep.subr.bf16.mxu1 %v1347_v5 }
  0x73   :  { %960 = vmatpush2.bf16.msra.mxu0 %v1342_v7 }
  0x74   :  { %1001 = vmatpush2.bf16.msra.mxu1 %v1345_v8  ;;  %961 = vmatprep.subr.bf16.mxu0 %v1350_v9 }
  0x75   :  { %1002 = vmatprep.subr.bf16.mxu1 %v1353_v10 }
  0x77   :  { %962 = vmatpush2.bf16.msra.mxu0 %v1348_v11 }
  0x78   :  { %1003 = vmatpush2.bf16.msra.mxu1 %v1351_v12  ;;  %963 = vmatprep.subr.bf16.mxu0 %v1356_v13 }
  0x79   :  { %1004 = vmatprep.subr.bf16.mxu1 %v1359_v14 }
  0x7b   :  { %964 = vmatpush2.bf16.msra.mxu0 %v1354_v15 }
  0x7c   :  { %1005 = vmatpush2.bf16.msra.mxu1 %v1357_v16  ;;  %965 = vmatprep.subr.bf16.mxu0 %v1362_v17 }
  0x7d   :  { %1006 = vmatprep.subr.bf16.mxu1 %v1365_v18 }
  0x7f   :  { %966 = vmatpush2.bf16.msra.mxu0 %v1360_v20 }
  0x80   :  { %1007 = vmatpush2.bf16.msra.mxu1 %v1363_v21 }
  0x82   :  { %968 = vmatmul.mubr.bf16.vlgmr.msra.gmra.mxu0 %v186_v19 }
  0x83   :  { %1009 = vmatmul.mubr.bf16.vlgmr.msra.gmra.mxu1 %v202_v22 }
 0x102   :  { %v887_v23 = vpop.f32.mrf.mxu0 }
 0x103   :  { %v928_v24 = vpop.f32.mrf.mxu1  ;;  %v888_v35 = vadd.f32 %v887_v23, %v148_v33 }
 0x104   :  { %v889_v6 = vpop.f32.mrf.mxu0 }
 0x105   :  { %v930_v25 = vpop.f32.mrf.mxu1  ;;  %v890_v36 = vadd.f32 %v889_v6, %v152_v34  ;;  %v929_v37 = vadd.f32 %v928_v24, %v888_v35 }
 0x106   :  { %v891_v26 = vpop.f32.mrf.mxu0 }
 0x107   :  { %v932_v27 = vpop.f32.mrf.mxu1  ;;  %v931_v40 = vadd.f32 %v930_v25, %v890_v36 }
 0x108   :  { %v892_v28 = vpop.f32.mrf.mxu0 }
 0x109   :  { %v933_v29 = vpop.f32.mrf.mxu1 }
 0x142   :  { %v969_v38 = vpop.f32.mrf.mxu0 }
 0x143   :  { %v1010_v39 = vpop.f32.mrf.mxu1  ;;  %v970_v41 = vadd.f32 %v969_v38, %v929_v37 }
 0x144   :  { %v971_v43 = vpop.f32.mrf.mxu0 }
 0x145   :  { %v1012_v44 = vpop.f32.mrf.mxu1  ;;  %v972_v45 = vadd.f32 %v971_v43, %v931_v40  ;;  %v1011_v48 = vadd.f32 %v1010_v39, %v970_v41 }
 0x146   :  { %v973_v46 = vpop.f32.mrf.mxu0 }
 0x147   :  { %v1014_v47 = vpop.f32.mrf.mxu1  ;;  %v1013_v50 = vadd.f32 %v1012_v44, %v972_v45 }
 0x148   :  { %v974_v51 = vpop.f32.mrf.mxu0 }
 0x149   :  { %v1015_v52 = vpop.f32.mrf.mxu1  ;;  %v1170_v53 = vpack.c.bf16 %v1013_v50, %v1011_v48 }
 0x14b   :  { %v1028_v42 = vrot.slane %v1170_v53, %v1522_v49 }
 0x14d   :  { %1171 = vst.sshfl [vmem:[%s1802_s3] sm:$0x5 pattern:$0x73625140] %v1028_v42 }

// kernel: convnet_forward.8
= control target key start
LH: loop header
LB: loop body
LE: loop exit
PB: predicated region body
PF: predicated region fallthrough
CT: control target
= control target key end

     0   :  { %vm842_vm0 = vcmask 519168   ;;  %s1395_s1 = inlined_call_operand.vmem [shape: bf16[1024,64], index: 1, kind: input, shape index: {}]   ;;  %s1396_s0 = inlined_call_operand.vmem [shape: bf16[32,1024], index: 0, kind: input, shape index: {}]   ;;  %s1397_s2 = inlined_call_operand.vmem [shape: f32[1,64], index: 2, kind: input, shape index: {}]   ;;  %s1398_s3 = inlined_call_operand.vmem [shape: bf16[32,64], index: 3, kind: output, shape index: {}]  }
   0x1   :  { %v1052_v0 = vld [vmem:[%s1395_s1 + $0x78] sm:$0xff]   ;;  %v1056_v4 = vld [vmem:[%s1395_s1 + $0x70] sm:$0xff]   ;;  %v1060_v8 = vld [vmem:[%s1395_s1 + $0x68] sm:$0xff]  }
   0x2   :  { %v1053_v1 = vld [vmem:[%s1395_s1 + $0xf8] sm:$0xff]   ;;  %940 = vmatprep.subr.bf16.mxu0 %v1052_v0  ;;  %v1057_v5 = vld [vmem:[%s1395_s1 + $0xf0] sm:$0xff]   ;;  %v1061_v9 = vld [vmem:[%s1395_s1 + $0xe8] sm:$0xff]  }
   0x3   :  { %v1054_v2 = vld [vmem:[%s1395_s1 + $0x38] sm:$0xff]   ;;  %968 = vmatprep.subr.bf16.mxu1 %v1053_v1  ;;  %v1058_v6 = vld [vmem:[%s1395_s1 + $0x30] sm:$0xff]   ;;  %v1062_v10 = vld [vmem:[%s1395_s1 + $0x28] sm:$0xff]  }
   0x4   :  { %v1055_v3 = vld [vmem:[%s1395_s1 + $0xb8] sm:$0xff]   ;;  %941 = vmatpush3.bf16.msra.mxu0 %v1054_v2  ;;  %v1059_v7 = vld [vmem:[%s1395_s1 + $0xb0] sm:$0xff]   ;;  %v1063_v11 = vld [vmem:[%s1395_s1 + $0xa8] sm:$0xff]  }
   0x5   :  { %969 = vmatpush3.bf16.msra.mxu1 %v1055_v3  ;;  %942 = vmatprep.subr.bf16.mxu0 %v1056_v4  ;;  %v1064_v12 = vld [vmem:[%s1395_s1 + $0x60] sm:$0xff]   ;;  %v1068_v16 = vld [vmem:[%s1395_s1 + $0x58] sm:$0xff]   ;;  %v1072_v20 = vld [vmem:[%s1395_s1 + $0x50] sm:$0xff]  }
   0x6   :  { %970 = vmatprep.subr.bf16.mxu1 %v1057_v5  ;;  %v1065_v13 = vld [vmem:[%s1395_s1 + $0xe0] sm:$0xff]   ;;  %v1069_v17 = vld [vmem:[%s1395_s1 + $0xd8] sm:$0xff]   ;;  %v1073_v21 = vld [vmem:[%s1395_s1 + $0xd0] sm:$0xff]  }
   0x7   :  { %v1066_v14 = vld [vmem:[%s1395_s1 + $0x20] sm:$0xff]   ;;  %v1070_v18 = vld [vmem:[%s1395_s1 + $0x18] sm:$0xff]   ;;  %v1074_v22 = vld [vmem:[%s1395_s1 + $0x10] sm:$0xff]  }
   0x8   :  { %943 = vmatpush3.bf16.msra.mxu0 %v1058_v6  ;;  %v1067_v15 = vld [vmem:[%s1395_s1 + $0xa0] sm:$0xff]   ;;  %v1071_v19 = vld [vmem:[%s1395_s1 + $0x98] sm:$0xff]   ;;  %v1075_v23 = vld [vmem:[%s1395_s1 + $0x90] sm:$0xff]  }
   0x9   :  { %971 = vmatpush3.bf16.msra.mxu1 %v1059_v7  ;;  %944 = vmatprep.subr.bf16.mxu0 %v1060_v8  ;;  %v1076_v24 = vld [vmem:[%s1395_s1 + $0x48] sm:$0xff]   ;;  %v1080_v28 = vld [vmem:[%s1395_s1 + $0x40] sm:$0xff]   ;;  %v1084_v40 = vld [vmem:[%s1395_s1 + $0x178] sm:$0xff]  }
   0xa   :  { %972 = vmatprep.subr.bf16.mxu1 %v1061_v9  ;;  %v1077_v25 = vld [vmem:[%s1395_s1 + $0xc8] sm:$0xff]   ;;  %v1081_v29 = vld [vmem:[%s1395_s1 + $0xc0] sm:$0xff]   ;;  %v1085_v41 = vld [vmem:[%s1395_s1 + $0x1f8] sm:$0xff]  }
   0xb   :  { %v1078_v26 = vld [vmem:[%s1395_s1 + $0x8] sm:$0xff]   ;;  %v1082_v30 = vld [vmem:[%s1395_s1] sm:$0xff]   ;;  %v1086_v42 = vld [vmem:[%s1395_s1 + $0x138] sm:$0xff]  }
   0xc   :  { %945 = vmatpush3.bf16.msra.mxu0 %v1062_v10  ;;  %v1079_v27 = vld [vmem:[%s1395_s1 + $0x88] sm:$0xff]   ;;  %v1083_v31 = vld [vmem:[%s1395_s1 + $0x80] sm:$0xff]   ;;  %v1087_v43 = vld [vmem:[%s1395_s1 + $0x1b8] sm:$0xff]  }
   0xd   :  { %973 = vmatpush3.bf16.msra.mxu1 %v1063_v11  ;;  %946 = vmatprep.subr.bf16.mxu0 %v1064_v12  ;;  %v15_v32 = vld [vmem:[%s1396_s0] sm:$0xff]  ;;  %v16_v34 = vld [vmem:[%s1396_s0 + $0x8] sm:$0xff]  ;;  %v1088_v44 = vld [vmem:[%s1395_s1 + $0x170] sm:$0xff]  }
   0xe   :  { %974 = vmatprep.subr.bf16.mxu1 %v1065_v13  ;;  %v19_v33 = vld [vmem:[%s1396_s0 + $0x20] sm:$0xff]  ;;  %v20_v37 = vld [vmem:[%s1396_s0 + $0x28] sm:$0xff]  ;;  %v1089_v45 = vld [vmem:[%s1395_s1 + $0x1f0] sm:$0xff]  }
   0xf   :  { %v852_v35 = vcombine.low %v15_v32, %v19_v33  ;;  %v853_v36 = vcombine.high %v15_v32, %v19_v33  ;;  %v854_v38 = vcombine.low %v16_v34, %v20_v37  ;;  %v855_v39 = vcombine.high %v16_v34, %v20_v37  ;;  %v1090_v46 = vld [vmem:[%s1395_s1 + $0x130] sm:$0xff]   ;;  %v1092_v48 = vld [vmem:[%s1395_s1 + $0x168] sm:$0xff]   ;;  %v1096_v52 = vld [vmem:[%s1395_s1 + $0x160] sm:$0xff]  }
  0x10   :  { %947 = vmatpush3.bf16.msra.mxu0 %v1066_v14  ;;  %v1091_v47 = vld [vmem:[%s1395_s1 + $0x1b0] sm:$0xff]   ;;  %v1093_v49 = vld [vmem:[%s1395_s1 + $0x1e8] sm:$0xff]   ;;  %v1097_v53 = vld [vmem:[%s1395_s1 + $0x1e0] sm:$0xff]  }
  0x11   :  { %975 = vmatpush3.bf16.msra.mxu1 %v1067_v15  ;;  %948 = vmatprep.subr.bf16.mxu0 %v1068_v16  ;;  %v1094_v50 = vld [vmem:[%s1395_s1 + $0x128] sm:$0xff]   ;;  %v1098_v54 = vld [vmem:[%s1395_s1 + $0x120] sm:$0xff]   ;;  %v1100_v56 = vld [vmem:[%s1395_s1 + $0x158] sm:$0xff]  }
  0x12   :  { %976 = vmatprep.subr.bf16.mxu1 %v1069_v17  ;;  %662 = vmatprep.mubr.bf16.mxu0 %v853_v36  ;;  %v1095_v51 = vld [vmem:[%s1395_s1 + $0x1a8] sm:$0xff]   ;;  %v1099_v55 = vld [vmem:[%s1395_s1 + $0x1a0] sm:$0xff]   ;;  %v1101_v57 = vld [vmem:[%s1395_s1 + $0x1d8] sm:$0xff]  }
  0x13   :  { %711 = vmatprep.mubr.bf16.mxu1 %v855_v39  ;;  %v23_v58 = vld [vmem:[%s1396_s0 + $0x40] sm:$0xff]  ;;  %v1102_v61 = vld [vmem:[%s1395_s1 + $0x118] sm:$0xff]   ;;  %v24_v0 = vld [vmem:[%s1396_s0 + $0x48] sm:$0xff] }
  0x14   :  { %949 = vmatpush3.bf16.msra.mxu0 %v1070_v18  ;;  %v27_v59 = vld [vmem:[%s1396_s0 + $0x60] sm:$0xff]  ;;  %v1103_v63 = vld [vmem:[%s1395_s1 + $0x198] sm:$0xff]   ;;  %v28_v1 = vld [vmem:[%s1396_s0 + $0x68] sm:$0xff] }
  0x15   :  { %977 = vmatpush3.bf16.msra.mxu1 %v1071_v19  ;;  %950 = vmatprep.subr.bf16.mxu0 %v1072_v20  ;;  %v861_v60 = vcombine.high %v23_v58, %v27_v59  ;;  %v860_v62 = vcombine.low %v23_v58, %v27_v59  ;;  %v863_v2 = vcombine.high %v24_v0, %v28_v1  ;;  %v1104_v4 = vld [vmem:[%s1395_s1 + $0x150] sm:$0xff]   ;;  %v1108_v8 = vld [vmem:[%s1395_s1 + $0x148] sm:$0xff]   ;;  %v1112_v12 = vld [vmem:[%s1395_s1 + $0x140] sm:$0xff]  }
  0x16   :  { %978 = vmatprep.subr.bf16.mxu1 %v1073_v21  ;;  %v862_v3 = vcombine.low %v24_v0, %v28_v1  ;;  %v1105_v5 = vld [vmem:[%s1395_s1 + $0x1d0] sm:$0xff]   ;;  %v1109_v9 = vld [vmem:[%s1395_s1 + $0x1c8] sm:$0xff]   ;;  %v1113_v13 = vld [vmem:[%s1395_s1 + $0x1c0] sm:$0xff]  }
  0x17   :  { %v1106_v6 = vld [vmem:[%s1395_s1 + $0x110] sm:$0xff]   ;;  %v1110_v10 = vld [vmem:[%s1395_s1 + $0x108] sm:$0xff]   ;;  %v1114_v14 = vld [vmem:[%s1395_s1 + $0x100] sm:$0xff]  }
  0x18   :  { %951 = vmatpush3.bf16.msra.mxu0 %v1074_v22  ;;  %v1107_v7 = vld [vmem:[%s1395_s1 + $0x190] sm:$0xff]   ;;  %v1111_v11 = vld [vmem:[%s1395_s1 + $0x188] sm:$0xff]   ;;  %v1115_v15 = vld [vmem:[%s1395_s1 + $0x180] sm:$0xff]  }
  0x19   :  { %979 = vmatpush3.bf16.msra.mxu1 %v1075_v23  ;;  %952 = vmatprep.subr.bf16.mxu0 %v1076_v24  ;;  %v17_v16 = vld [vmem:[%s1396_s0 + $0x10] sm:$0xff]  ;;  %v18_v18 = vld [vmem:[%s1396_s0 + $0x18] sm:$0xff] }
  0x1a   :  { %980 = vmatprep.subr.bf16.mxu1 %v1077_v25  ;;  %v21_v17 = vld [vmem:[%s1396_s0 + $0x30] sm:$0xff]  ;;  %v22_v19 = vld [vmem:[%s1396_s0 + $0x38] sm:$0xff] }
  0x1b   :  { %v856_v20 = vcombine.low %v17_v16, %v21_v17  ;;  %v857_v21 = vcombine.high %v17_v16, %v21_v17  ;;  %v858_v22 = vcombine.low %v18_v18, %v22_v19  ;;  %v859_v23 = vcombine.high %v18_v18, %v22_v19  ;;  %v25_v24 = vld [vmem:[%s1396_s0 + $0x50] sm:$0xff] }
  0x1c   :  { %953 = vmatpush3.bf16.msra.mxu0 %v1078_v26  ;;  %v29_v25 = vld [vmem:[%s1396_s0 + $0x70] sm:$0xff]  ;;  %v26_v26 = vld [vmem:[%s1396_s0 + $0x58] sm:$0xff] }
  0x1d   :  { %981 = vmatpush3.bf16.msra.mxu1 %v1079_v27  ;;  %954 = vmatprep.subr.bf16.mxu0 %v1080_v28  ;;  %v865_v27 = vcombine.high %v25_v24, %v29_v25  ;;  %v30_v28 = vld [vmem:[%s1396_s0 + $0x78] sm:$0xff] }
  0x1e   :  { %982 = vmatprep.subr.bf16.mxu1 %v1081_v29  ;;  %v867_v29 = vcombine.high %v26_v26, %v30_v28 }
  0x20   :  { %955 = vmatpush3.bf16.msra.mxu0 %v1082_v30  ;;  %v864_v30 = vcombine.low %v25_v24, %v29_v25 }
  0x21   :  { %983 = vmatpush3.bf16.msra.mxu1 %v1083_v31  ;;  %996 = vmatprep.subr.bf16.mxu0 %v1084_v40  ;;  %v866_v31 = vcombine.low %v26_v26, %v30_v28 }
  0x22   :  { %1024 = vmatprep.subr.bf16.mxu1 %v1085_v41 }
  0x23   :  { %663 = vmatmul.mubr.bf16.vlgmr.msra.gmra.mxu0 %v852_v35 }
  0x24   :  { %712 = vmatmul.mubr.bf16.vlgmr.msra.gmra.mxu1 %v854_v38  ;;  %997 = vmatpush3.bf16.msra.mxu0 %v1086_v42 }
  0x25   :  { %1025 = vmatpush3.bf16.msra.mxu1 %v1087_v43  ;;  %998 = vmatprep.subr.bf16.mxu0 %v1088_v44 }
  0x26   :  { %1026 = vmatprep.subr.bf16.mxu1 %v1089_v45  ;;  %670 = vmatprep.mubr.bf16.mxu0 %v861_v60 }
  0x27   :  { %719 = vmatprep.mubr.bf16.mxu1 %v863_v2 }
  0x28   :  { %999 = vmatpush3.bf16.msra.mxu0 %v1090_v46 }
  0x29   :  { %1027 = vmatpush3.bf16.msra.mxu1 %v1091_v47  ;;  %1000 = vmatprep.subr.bf16.mxu0 %v1092_v48  ;;  %v851_v47 = vld [vmem:[%s1397_s2] ss:$0 sm:$0xff] }
  0x2a   :  { %1028 = vmatprep.subr.bf16.mxu1 %v1093_v49 }
  0x2b   :  { %671 = vmatmul.mubr.bf16.gmra.mxu0 %v860_v62 }
  0x2c   :  { %1001 = vmatpush3.bf16.msra.mxu0 %v1094_v50  ;;  %720 = vmatmul.mubr.bf16.gmra.mxu1 %v862_v3 }
  0x2d   :  { %1029 = vmatpush3.bf16.msra.mxu1 %v1095_v51  ;;  %1002 = vmatprep.subr.bf16.mxu0 %v1096_v52 }
  0x2e   :  { %1030 = vmatprep.subr.bf16.mxu1 %v1097_v53  ;;  %760 = vmatprep.mubr.bf16.mxu0 %v857_v21 }
  0x2f   :  { %809 = vmatprep.mubr.bf16.mxu1 %v859_v23 }
  0x30   :  { %1003 = vmatpush3.bf16.msra.mxu0 %v1098_v54 }
  0x31   :  { %1031 = vmatpush3.bf16.msra.mxu1 %v1099_v55  ;;  %1004 = vmatprep.subr.bf16.mxu0 %v1100_v56 }
  0x32   :  { %1032 = vmatprep.subr.bf16.mxu1 %v1101_v57 }
  0x34   :  { %1005 = vmatpush3.bf16.msra.mxu0 %v1102_v61 }
  0x35   :  { %1033 = vmatpush3.bf16.msra.mxu1 %v1103_v63  ;;  %1006 = vmatprep.subr.bf16.mxu0 %v1104_v4 }
  0x36   :  { %1034 = vmatprep.subr.bf16.mxu1 %v1105_v5 }
  0x38   :  { %1007 = vmatpush3.bf16.msra.mxu0 %v1106_v6 }
  0x39   :  { %1035 = vmatpush3.bf16.msra.mxu1 %v1107_v7  ;;  %1008 = vmatprep.subr.bf16.mxu0 %v1108_v8 }
  0x3a   :  { %1036 = vmatprep.subr.bf16.mxu1 %v1109_v9 }
  0x3c   :  { %1009 = vmatpush3.bf16.msra.mxu0 %v1110_v10 }
  0x3d   :  { %1037 = vmatpush3.bf16.msra.mxu1 %v1111_v11  ;;  %1010 = vmatprep.subr.bf16.mxu0 %v1112_v12 }
  0x3e   :  { %1038 = vmatprep.subr.bf16.mxu1 %v1113_v13 }
  0x40   :  { %1011 = vmatpush3.bf16.msra.mxu0 %v1114_v14 }
  0x41   :  { %1039 = vmatpush3.bf16.msra.mxu1 %v1115_v15 }
  0x43   :  { %761 = vmatmul.mubr.bf16.vlgmr.msra.gmra.mxu0 %v856_v20 }
  0x44   :  { %810 = vmatmul.mubr.bf16.vlgmr.msra.gmra.mxu1 %v858_v22  ;;  %768 = vmatprep.mubr.bf16.mxu0 %v865_v27 }
  0x45   :  { %817 = vmatprep.mubr.bf16.mxu1 %v867_v29 }
  0x4b   :  { %769 = vmatmul.mubr.bf16.gmra.mxu0 %v864_v30 }
  0x4c   :  { %818 = vmatmul.mubr.bf16.gmra.mxu1 %v866_v31 }
  0xe3   :  { %v956_v32 = vpop.f32.mrf.mxu0 }
  0xe4   :  { %v984_v33 = vpop.f32.mrf.mxu1 }
  0xe5   :  { %v957_v34 = vpop.f32.mrf.mxu0 }
  0xe6   :  { %v985_v35 = vpop.f32.mrf.mxu1  ;;  %v958_v46 = vadd.f32 %v957_v34, %v956_v32 }
  0xe7   :  { %v959_v36 = vpop.f32.mrf.mxu0  ;;  %v986_v51 = vadd.f32 %v985_v35, %v984_v33 }
  0xe8   :  { %v987_v37 = vpop.f32.mrf.mxu1  ;;  %v665_v50 = vadd.f32 %v958_v46, %v851_v47 }
  0xe9   :  { %v960_v38 = vpop.f32.mrf.mxu0 }
  0xea   :  { %v988_v39 = vpop.f32.mrf.mxu1  ;;  %v961_v52 = vadd.f32 %v960_v38, %v959_v36  ;;  %v714_v58 = vadd.f32 %v986_v51, %v665_v50 }
  0xeb   :  { %v962_v40 = vpop.f32.mrf.mxu0  ;;  %v989_v63 = vadd.f32 %v988_v39, %v987_v37 }
  0xec   :  { %v990_v41 = vpop.f32.mrf.mxu1  ;;  %v668_v59 = vadd.f32 %v961_v52, %v851_v47 }
  0xed   :  { %v963_v42 = vpop.f32.mrf.mxu0 }
  0xee   :  { %v991_v43 = vpop.f32.mrf.mxu1  ;;  %v964_v55 = vadd.f32 %v963_v42, %v962_v40  ;;  %v717_v6 = vadd.f32 %v989_v63, %v668_v59 }
  0xef   :  { %v965_v44 = vpop.f32.mrf.mxu0  ;;  %v992_v3 = vadd.f32 %v991_v43, %v990_v41 }
  0xf0   :  { %v993_v45 = vpop.f32.mrf.mxu1  ;;  %v673_v2 = vadd.f32 %v964_v55, %v851_v47 }
  0xf1   :  { %v966_v48 = vpop.f32.mrf.mxu0 }
  0xf2   :  { %v994_v49 = vpop.f32.mrf.mxu1  ;;  %v967_v7 = vadd.f32 %v966_v48, %v965_v44  ;;  %v722_v15 = vadd.f32 %v992_v3, %v673_v2 }
  0xf3   :  { %v995_v19 = vadd.f32 %v994_v49, %v993_v45 }
  0xf4   :  { %v676_v18 = vadd.f32 %v967_v7, %v851_v47 }
  0xf6   :  { %v725_v29 = vadd.f32 %v995_v19, %v676_v18 }
 0x103   :  { %v1012_v53 = vpop.f32.mrf.mxu0 }
 0x104   :  { %v1040_v54 = vpop.f32.mrf.mxu1 }
 0x105   :  { %v1013_v56 = vpop.f32.mrf.mxu0 }
 0x106   :  { %v1041_v57 = vpop.f32.mrf.mxu1  ;;  %v1014_v60 = vadd.f32 %v1013_v56, %v1012_v53 }
 0x107   :  { %v1015_v61 = vpop.f32.mrf.mxu0  ;;  %v1042_v1 = vadd.f32 %v1041_v57, %v1040_v54 }
 0x108   :  { %v1043_v62 = vpop.f32.mrf.mxu1  ;;  %v763_v0 = vadd.f32 %v1014_v60, %v714_v58 }
 0x109   :  { %v1016_v4 = vpop.f32.mrf.mxu0 }
 0x10a   :  { %v1044_v5 = vpop.f32.mrf.mxu1  ;;  %v812_v8 = vadd.f32 %v1042_v1, %v763_v0  ;;  %v1017_v9 = vadd.f32 %v1016_v4, %v1015_v61 }
 0x10b   :  { %v1018_v10 = vpop.f32.mrf.mxu0  ;;  %v1045_v14 = vadd.f32 %v1044_v5, %v1043_v62 }
 0x10c   :  { %v1046_v11 = vpop.f32.mrf.mxu1  ;;  %v936_v12 = vpack.c.bf16 %v812_v8, %v812_v8  ;;  %v766_v13 = vadd.f32 %v1017_v9, %v717_v6 }
 0x10d   :  { %v1019_v16 = vpop.f32.mrf.mxu0 }
 0x10e   :  { %v1047_v17 = vpop.f32.mrf.mxu1  ;;  %843 = vst.msk [vmem:[%s1398_s3] sm:$0xf] %vm842_vm0, %v936_v12  ;;  %v815_v20 = vadd.f32 %v1045_v14, %v766_v13  ;;  %v1020_v21 = vadd.f32 %v1019_v16, %v1018_v10 }
 0x10f   :  { %v1021_v22 = vpop.f32.mrf.mxu0  ;;  %v1048_v26 = vadd.f32 %v1047_v17, %v1046_v11 }
 0x110   :  { %v1049_v23 = vpop.f32.mrf.mxu1  ;;  %v937_v24 = vpack.c.bf16 %v815_v20, %v815_v20  ;;  %v771_v25 = vadd.f32 %v1020_v21, %v722_v15 }
 0x111   :  { %v1022_v27 = vpop.f32.mrf.mxu0 }
 0x112   :  { %v1050_v28 = vpop.f32.mrf.mxu1  ;;  %844 = vst.msk [vmem:[%s1398_s3 + $0x4] sm:$0xf] %vm842_vm0, %v937_v24  ;;  %v820_v30 = vadd.f32 %v1048_v26, %v771_v25  ;;  %v1023_v31 = vadd.f32 %v1022_v27, %v1021_v22 }
 0x113   :  { %v1051_v34 = vadd.f32 %v1050_v28, %v1049_v23 }
 0x114   :  { %v938_v32 = vpack.c.bf16 %v820_v30, %v820_v30  ;;  %v774_v33 = vadd.f32 %v1023_v31, %v725_v29 }
 0x116   :  { %845 = vst.msk [vmem:[%s1398_s3 + $0x8] sm:$0xf] %vm842_vm0, %v938_v32  ;;  %v823_v35 = vadd.f32 %v1051_v34, %v774_v33 }
 0x118   :  { %v939_v36 = vpack.c.bf16 %v823_v35, %v823_v35 }
 0x11a   :  { %846 = vst.msk [vmem:[%s1398_s3 + $0xc] sm:$0xf] %vm842_vm0, %v939_v36 }

// kernel: convnet_forward.11
= control target key start
LH: loop header
LB: loop body
LE: loop exit
PB: predicated region body
PF: predicated region fallthrough
CT: control target
= control target key end

     0   :  { %13 = vsyncpa [#allocation3], 0  ;;  %v386_v1 = vmov 0.0   ;;  %vm387_vm0 = vmmov 0   ;;  %vm37_vm1 = vcmask 130048   ;;  %s508_s0 = inlined_call_operand.vmem [shape: f32[2,16], index: 0, kind: input, shape index: {}]   ;;  %s509_s1 = inlined_call_operand.vmem [shape: f32[16,128], index: 1, kind: input, shape index: {}]   ;;  %s510_s2 = inlined_call_operand.vmem [shape: f32[1,128], index: 2, kind: input, shape index: {}]   ;;  %s511_s3 = inlined_call_operand.vmem [shape: f32[128,128], index: 3, kind: input, shape index: {}]   ;;  %s512_s4 = inlined_call_operand.vmem [shape: f32[1,128], index: 4, kind: input, shape index: {}]   ;;  %s513_s5 = inlined_call_operand.vmem [shape: f32[2,128], index: 5, kind: input, shape index: {}]   ;;  %s514_s6 = inlined_call_operand.hbm [shape: f32[2,128], index: 6, kind: output, shape index: {0}]   ;;  %s515_s7 = inlined_call_operand.hbm [shape: f32[1,1], index: 7, kind: output, shape index: {1}]  }
   0x1   :  { %v29_v0 = vld [vmem:[%s509_s1 + $0x8] sm:$0xff]  ;;  %292 = vmatprep.subr.mxu0 %v386_v1  ;;  %v28_v2 = vld [vmem:[%s509_s1] sm:$0xff]  ;;  %296 = vmatprep.mubr.msk.f32.mxu0 %vm387_vm0, %v386_v1  ;;  %v127_v3 = vld [vmem:[%s511_s3 + $0x78] sm:$0xff] }
   0x2   :  { %293 = vmatpush3.msra.mxu0 %v29_v0  ;;  %v27_v4 = vld [vmem:[%s508_s0] sm:$0x3]  ;;  %299 = vmatprep.subr.mxu1 %v386_v1  ;;  %v126_v5 = vld [vmem:[%s511_s3 + $0x70] sm:$0xff]  ;;  %v125_v6 = vld [vmem:[%s511_s3 + $0x68] sm:$0xff] }
   0x3   :  { %294 = vmatprep.subr.mxu0 %v386_v1  ;;  %300 = vmatpush3.msra.mxu1 %v127_v3 }
   0x4   :  { %295 = vmatpush3.msra.mxu0 %v28_v2  ;;  %301 = vmatprep.subr.mxu1 %v386_v1 }
   0x5   :  { %297 = vmatmul.mubr.msk.f32.vlgmr.msra.gmra.mxu0 %vm37_vm1, %v27_v4  ;;  %302 = vmatpush3.msra.mxu1 %v126_v5 }
   0x6   :  { %14 = vsyncpa [#allocation5], 0  ;;  %303 = vmatprep.subr.mxu1 %v386_v1  ;;  %v124_v7 = vld [vmem:[%s511_s3 + $0x60] sm:$0xff]  ;;  %331 = vmatprep.mubr.msk.f32.mxu1 %vm387_vm0, %v386_v1  ;;  %v123_v8 = vld [vmem:[%s511_s3 + $0x58] sm:$0xff]  ;;  %v205_v25 = vlaneseq  ;;  %vm209_vm3 = vcmask 1041408  }
   0x7   :  { %304 = vmatpush3.msra.mxu1 %v125_v6  ;;  %v122_v9 = vld [vmem:[%s511_s3 + $0x50] sm:$0xff]  ;;  %v121_v10 = vld [vmem:[%s511_s3 + $0x48] sm:$0xff]  ;;  %v120_v11 = vld [vmem:[%s511_s3 + $0x40] sm:$0xff] }
   0x8   :  { %305 = vmatprep.subr.mxu1 %v386_v1  ;;  %v119_v12 = vld [vmem:[%s511_s3 + $0x38] sm:$0xff]  ;;  %v118_v13 = vld [vmem:[%s511_s3 + $0x30] sm:$0xff]  ;;  %v117_v14 = vld [vmem:[%s511_s3 + $0x28] sm:$0xff]  ;;  %v206_v26 = vand.u32 127, %v205_v25 }
   0x9   :  { %306 = vmatpush3.msra.mxu1 %v124_v7  ;;  %v116_v15 = vld [vmem:[%s511_s3 + $0x20] sm:$0xff]  ;;  %v115_v16 = vld [vmem:[%s511_s3 + $0x18] sm:$0xff]  ;;  %v114_v17 = vld [vmem:[%s511_s3 + $0x10] sm:$0xff] }
   0xa   :  { %307 = vmatprep.subr.mxu1 %v386_v1  ;;  %v113_v18 = vld [vmem:[%s511_s3 + $0x8] sm:$0xff]  ;;  %v112_v19 = vld [vmem:[%s511_s3] sm:$0xff]  ;;  %vm207_vm2 = vcmp.lt.s32.totalorder %v206_v26, 4 }
   0xb   :  { %308 = vmatpush3.msra.mxu1 %v123_v8  ;;  %v269_v20 = vld [vmem:[%s510_s2] ss:$0 sm:$0xff] }
   0xc   :  { %309 = vmatprep.subr.mxu1 %v386_v1  ;;  %v271_v27 = vld [vmem:[%s512_s4] ss:$0 sm:$0xff]  ;;  %s388_s4 = smov [#allocation2]  }
   0xd   :  { %310 = vmatpush3.msra.mxu1 %v122_v9  ;;  %v223_v42 = vld [vmem:[%s513_s5] sm:$0x3]  ;;  %s247_s16 = sshll.u32 %s388_s4, 4  ;;  %s248_s16 = int_to_ptr.vmem [resolvable:$true] %s247_s16 }
   0xe   :  { %311 = vmatprep.subr.mxu1 %v386_v1  ;;  %s342_s17 = scalar_lea.vmem %s248_s16, 32  ;;  %p347_p1 = scmp.lt.s32.totalorder %s248_s16, %s248_s16 }
   0xf   :  { %312 = vmatpush3.msra.mxu1 %v121_v10  ;;  %p343_p0 = scmp.ne.s32.totalorder %s248_s16, %s342_s17  ;;  %p348_p2 = scmp.lt.s32.totalorder %s342_s17, %s342_s17 }
  0x10   :  { %313 = vmatprep.subr.mxu1 %v386_v1 }
  0x11   :  { %314 = vmatpush3.msra.mxu1 %v120_v11  ;;  %p349_p3 = por %p348_p2, %p347_p1 }
  0x12   :  { %315 = vmatprep.subr.mxu1 %v386_v1 }
  0x13   :  { %316 = vmatpush3.msra.mxu1 %v119_v12  ;;  %p350_p4 = pnand %p349_p3, %p343_p0 }
  0x14   :  { %317 = vmatprep.subr.mxu1 %v386_v1 }
  0x15   :  { %318 = vmatpush3.msra.mxu1 %v118_v13 }
  0x16   :  { %319 = vmatprep.subr.mxu1 %v386_v1 }
  0x17   :  { %320 = vmatpush3.msra.mxu1 %v117_v14 }
  0x18   :  { %321 = vmatprep.subr.mxu1 %v386_v1 }
  0x19   :  { %322 = vmatpush3.msra.mxu1 %v116_v15 }
  0x1a   :  { %323 = vmatprep.subr.mxu1 %v386_v1 }
  0x1b   :  { %324 = vmatpush3.msra.mxu1 %v115_v16 }
  0x1c   :  { %325 = vmatprep.subr.mxu1 %v386_v1 }
  0x1d   :  { %326 = vmatpush3.msra.mxu1 %v114_v17 }
  0x1e   :  { %327 = vmatprep.subr.mxu1 %v386_v1 }
  0x1f   :  { %328 = vmatpush3.msra.mxu1 %v113_v18 }
  0x20   :  { %329 = vmatprep.subr.mxu1 %v386_v1 }
  0x21   :  { %330 = vmatpush3.msra.mxu1 %v112_v19 }
  0xc5   :  { %v107_v21 = vpop.f32.mrf.mxu0 }
  0xc6   :  { %v108_v22 = vadd.f32 %v269_v20, %v107_v21 }
  0xc7   :  { %v298_v23 = vpop.f32.mrf.mxu0 }
  0xc8   :  { %v111_v24 = vmax.f32 %v108_v22, 0.0 }
  0xca   :  { %332 = vmatmul.mubr.f32.vlgmr.msra.gmra.mxu1 %v111_v24 }
 0x18a   :  { %v201_v28 = vpop.f32.mrf.mxu1 }
 0x18b   :  { %v202_v29 = vadd.f32 %v271_v27, %v201_v28 }
 0x18c   :  { %v333_v30 = vpop.f32.mrf.mxu1 }
 0x18d   :  { %240 = vst [vmem:[#allocation2] sm:$0x3] %v202_v29  ;;  %v208_v31 = vsel %vm207_vm2, %v202_v29, -1e+30 }
 0x18e   :  { %v210_v32 = vsel %vm209_vm3, %v208_v31, -inf }
 0x18f   :  { %211 = vmax.xlane.f32.xlu0 %v210_v32 }
 0x218   :  { %v212_v33 = vpop.xlane.xlu0 %211 }
 0x219   :  { %v213_v34 = vsub.f32 %v208_v31, %v212_v33 }
 0x21b   :  { %v214_v35 = vmul.f32 1.442695, %v213_v34 }
 0x21d   :  { %338 = vpow2.f32 %v214_v35 }
 0x22a   :  { %v339_v36 = vpop.eup %338 }
 0x22b   :  { %v216_v37 = vsel %vm209_vm3, %v339_v36, 0.0 }
 0x22c   :  { %217 = vadd.xlane.f32.xlu0 %v216_v37 }
 0x2b5   :  { %v218_v38 = vpop.xlane.xlu0 %217 }
 0x2b6   :  { %340 = vlog2.f32 %v218_v38 }
 0x2c3   :  { %v341_v39 = vpop.eup %340 }
 0x2c4   :  { %v220_v40 = vmul.f32 0.6931472, %v341_v39 }
 0x2c6   :  { %v221_v41 = vadd.f32 %v220_v40, %v212_v33 }
 0x2c8   :  { %v222_v43 = vsub.f32 %v202_v29, %v221_v41 }
 0x2ca   :  { %v224_v44 = vmul.f32 %v223_v42, %v222_v43 }
 0x2cc   :  { %v225_v45 = vsel %vm209_vm3, %v224_v44, 0.0 }
 0x2cd   :  { %226 = vadd.xlane.f32.xlu1 %v225_v45 }
 0x2ce   :  { %353 = shalt.err (!%p350_p4)
}
 0x2cf   :  { %250 = dma.vmem_to_hbm [thread:$0]  %s248_s16, 32, %s514_s6, [#allocation3]   ;;  %vm238_vm4 = vcmask 0  }
 0x2d0   :  { %s389_s5 = smov [#allocation4]  }
 0x2d1   :  { %s257_s20 = sshll.u32 %s389_s5, 4  ;;  %s258_s20 = int_to_ptr.vmem [resolvable:$true] %s257_s20 }
 0x2d2   :  { %s362_s21 = scalar_lea.vmem %s258_s20, 16  ;;  %s366_s22 = scalar_lea.vmem %s258_s20, 32 }
 0x2d3   :  { %p363_p5 = scmp.ne.s32.totalorder %s258_s20, %s362_s21  ;;  %p367_p6 = scmp.lt.s32.totalorder %s258_s20, %s258_s20 }
 0x2d4   :  { %p368_p7 = scmp.lt.s32.totalorder %s366_s22, %s362_s21 }
 0x2d6   :  { %p369_p8 = por %p368_p7, %p367_p6 }
 0x2d8   :  { %p370_p9 = pnand %p369_p8, %p363_p5 }
 0x356   :  { %v227_v46 = vpop.xlane.xlu1 %226 }
 0x357   :  { %v228_v47 = vsub.f32 0.0, %v227_v46 }
 0x359   :  { %v229_v48 = vsel %vm209_vm3, %v228_v47, 0.0 }
 0x35a   :  { %v230_v49 = vrot.slane %v229_v48, 4 }
 0x35c   :  { %v231_v50 = vadd.f32 %v230_v49, %v229_v48 }
 0x35e   :  { %v232_v51 = vrot.slane %v231_v50, 2 }
 0x360   :  { %v233_v52 = vadd.f32 %v232_v51, %v231_v50 }
 0x362   :  { %v234_v53 = vrot.slane %v233_v52, 1 }
 0x364   :  { %v235_v54 = vadd.f32 %v234_v53, %v233_v52 }
 0x366   :  { %v237_v55 = vmul.f32 0.5, %v235_v54 }
 0x368   :  { %239 = vst.msk [vmem:[#allocation4] sm:$0x1] %vm238_vm4, %v237_v55 }
 0x369   :  { %373 = shalt.err (!%p370_p9)
}
 0x36a   :  { %260 = dma.vmem_to_hbm [thread:$0]  %s258_s20, 16, %s515_s7, [#allocation5]  }
 0x36b   :  { %382 = dma.done.wait [#allocation3], 32  }
 0x36c   :  { %383 = vsyncadd [#allocation3], 4294967264 }
 0x36d   :  { %384 = dma.done.wait [#allocation5], 16  }
 0x36e   :  { %385 = vsyncadd [#allocation5], 4294967280 }
 0x36f   :  { %267 = vsyncpa [#allocation3], 1 }
 0x370   :  { %268 = vsyncpa [#allocation5], 1 }

</bundles_post_ra>
